<compile_context>
chip_gen: v6e
topology: v6e:2x2x1
jax: 0.10.0
libtpu: 0.0.40
codegen_flags: <defaults>
</compile_context>

<pallas_src>
import math
import functools

import jax
import jax.numpy as jnp
import numpy as np
from jax.experimental import pallas as pl
from jax.experimental.pallas import tpu as pltpu

LANE = 128          # TPU lane width: everything is lane-padded to this
NEG_INF = -1e30


# ----------------------------- kernel ---------------------------------------

def decoder_kernel(x_ref, w_qkv_ref, w_big_ref, b_ref, out_ref, *,
                   dim_embed, num_heads, dim_head):
    C, H, DH = dim_embed, num_heads, dim_head
    T = x_ref.shape[0]
    f32, bf16 = jnp.float32, jnp.bfloat16

    # bias / LN slab row layout (must match _pack_params)
    r_qkv = 2
    r_bo = 2 + 3 * H
    r_ln2w, r_ln2b = r_bo + 1, r_bo + 2
    r_b1, r_b2 = r_bo + 3, r_bo + 4
    r_mask = r_bo + 5

    lane_mask = b_ref[r_mask:r_mask + 1, :]          # (1, LANE): 1.0 for lane < C
    inv_c = 1.0 / C

    def layer_norm(v, w_row, b_row, eps=1e-5):
        # two-pass form; padded lanes of v are zero so the mean is exact, and the
        # lane mask keeps the padded lanes out of the variance.
        mu = jnp.sum(v, axis=-1, keepdims=True) * inv_c
        d = (v - mu) * lane_mask
        var = jnp.sum(d * d, axis=-1, keepdims=True) * inv_c
        return d * jax.lax.rsqrt(var + eps) * w_row + b_row

    x = x_ref[...].astype(f32)                       # (T, LANE), lanes >= C are zero

    # --- x = x + MHA(LN1(x)) --------------------------------------------------
    xn = layer_norm(x, b_ref[0:1, :], b_ref[1:2, :])
    # One fused QKV matmul; output columns are per-head 128-lane-aligned blocks
    # [q_h | k_h | v_h], so the per-head slices below are whole-vreg selections.
    qkv = jnp.dot(xn.astype(bf16), w_qkv_ref[...], preferred_element_type=f32)

    # Per-tile causal mask: plain (T, T) compare (grid is over batch).
    row = jax.lax.broadcasted_iota(jnp.int32, (T, T), 0)
    col = jax.lax.broadcasted_iota(jnp.int32, (T, T), 1)
    mask_bias = jnp.where(row >= col, 0.0, NEG_INF).astype(f32)

    dn = (((1,), (1,)), ((), ()))                    # q @ k^T (contract lane dims)
    attn = jnp.zeros((T, LANE), f32)
    for h in range(H):                               # static unroll over heads
        c0 = 3 * h * LANE
        rq = r_qkv + 3 * h
        q = (qkv[:, c0:c0 + LANE] + b_ref[rq:rq + 1, :]).astype(bf16)
        k = (qkv[:, c0 + LANE:c0 + 2 * LANE] + b_ref[rq + 1:rq + 2, :]).astype(bf16)
        v = (qkv[:, c0 + 2 * LANE:c0 + 3 * LANE] + b_ref[rq + 2:rq + 3, :]).astype(bf16)
        # (w_q, b_q were pre-scaled by 1/sqrt(DH) when packing.)
        s = jax.lax.dot_general(q, k, dn, preferred_element_type=f32) + mask_bias
        m = jnp.max(s, axis=-1, keepdims=True)
        p = jnp.exp(s - m)                           # f32 exp (v5e has no bf16 EUP)
        p = p * pl.reciprocal(jnp.sum(p, axis=-1, keepdims=True), approx=True)
        o = jnp.dot(p.astype(bf16), v, preferred_element_type=f32)    # (T, LANE)
        # fold this head's output projection straight into the accumulator
        attn += jnp.dot(o.astype(bf16), w_big_ref[h * LANE:(h + 1) * LANE, :],
                        preferred_element_type=f32)
    x1 = x + attn + b_ref[r_bo:r_bo + 1, :]          # padded lanes stay zero

    # --- x = x + FFN(LN2(x)) ----------------------------------------------------
    xn2 = layer_norm(x1, b_ref[r_ln2w:r_ln2w + 1, :], b_ref[r_ln2b:r_ln2b + 1, :])
    hid = jnp.maximum(
        jnp.dot(xn2.astype(bf16), w_big_ref[H * LANE:(H + 1) * LANE, :],
                preferred_element_type=f32) + b_ref[r_b1:r_b1 + 1, :], 0.0)
    y = jnp.dot(hid.astype(bf16), w_big_ref[(H + 1) * LANE:(H + 2) * LANE, :],
                preferred_element_type=f32) + b_ref[r_b2:r_b2 + 1, :]
    out_ref[...] = (x1 + y).astype(out_ref.dtype)    # lane-dense (T, 128) store


# ----------------------------- wrapper ---------------------------------------

def _pack_params(params, *, num_heads, dim_head, dim_embed, dim_ff):
    C, F, H, DH = dim_embed, dim_ff, num_heads, dim_head
    f32 = jnp.float32
    scale = 1.0 / math.sqrt(DH)

    def pad2(m, rows=LANE, cols=LANE):
        m = jnp.asarray(m, f32)
        return jnp.zeros((rows, cols), f32).at[:m.shape[0], :m.shape[1]].set(m)

    # fused QKV weight: per-head 128-lane-aligned blocks [q_h | k_h | v_h]
    qkv_blocks = []
    for h in range(H):
        qkv_blocks += [pad2(params['wq'][h] * scale),   # fold 1/sqrt(DH) into q
                       pad2(params['wk'][h]),
                       pad2(params['wv'][h])]
    w_qkv = jnp.concatenate(qkv_blocks, axis=1).astype(jnp.bfloat16)  # (128, 3*H*128)

    # per-head output projections, then FF1, FF2: one row-stacked lane-dense slab
    w_big = jnp.concatenate(
        [pad2(params['wo'][h]) for h in range(H)]
        + [pad2(params['w1']), pad2(params['w2'])], axis=0).astype(jnp.bfloat16)

    # bias / LayerNorm / lane-mask slab (f32, lane-padded rows)
    n_rows = 3 * H + 8
    n_rows_pad = ((n_rows + 7) // 8) * 8
    rows = [pad2(params['ln1_w'], 1, LANE), pad2(params['ln1_b'], 1, LANE)]
    for h in range(H):
        rows += [pad2(params['bq'][h] * scale, 1, LANE),
                 pad2(params['bk'][h], 1, LANE),
                 pad2(params['bv'][h], 1, LANE)]
    rows += [pad2(params['bo'], 1, LANE),
             pad2(params['ln2_w'], 1, LANE), pad2(params['ln2_b'], 1, LANE),
             pad2(params['b1'], 1, LANE), pad2(params['b2'], 1, LANE),
             pad2(jnp.ones((1, C), f32), 1, LANE)]      # lane mask (lane < C)
    rows += [jnp.zeros((1, LANE), f32)] * (n_rows_pad - n_rows)
    b_slab = jnp.concatenate(rows, axis=0)               # (n_rows_pad, 128)
    return w_qkv, w_big, b_slab


def transformer_decoder(x, params, *, num_heads, dim_head):
    B, T, C = x.shape
    F = params['w1'].shape[1]
    assert C <= LANE and F <= LANE and num_heads * dim_head == C

    w_qkv, w_big, b_slab = _pack_params(params, num_heads=num_heads,
                                        dim_head=dim_head, dim_embed=C, dim_ff=F)

    # bf16 activations on the HBM<->VMEM path; f32 math inside the kernel.
    x_pad = jnp.zeros((B, T, LANE), jnp.bfloat16).at[:, :, :C].set(
        x.astype(jnp.bfloat16))

    kernel = functools.partial(decoder_kernel, dim_embed=C,
                               num_heads=num_heads, dim_head=dim_head)

    out_pad = pl.pallas_call(
        kernel,
        out_shape=jax.ShapeDtypeStruct((B, T, LANE), jnp.float32),
        grid=(B,),                                   # one batch element per step
        in_specs=[
            pl.BlockSpec((None, T, LANE), lambda b: (b, 0, 0)),
            pl.BlockSpec(w_qkv.shape, lambda b: (0, 0)),   # resident weights
            pl.BlockSpec(w_big.shape, lambda b: (0, 0)),
            pl.BlockSpec(b_slab.shape, lambda b: (0, 0)),
        ],
        out_specs=pl.BlockSpec((None, T, LANE), lambda b: (b, 0, 0)),
        compiler_params=pltpu.CompilerParams(dimension_semantics=("parallel",)),
    )(x_pad, w_qkv, w_big, b_slab)

    return out_pad[:, :, :C].astype(x.dtype)


# ----------------------------- reference (plain JAX, f32) --------------------

def reference(x, p, *, num_heads, dim_head):
    def ln(v, w, b):
        mu = v.mean(-1, keepdims=True)
        var = ((v - mu) ** 2).mean(-1, keepdims=True)
        return (v - mu) / jnp.sqrt(var + 1e-5) * w[0] + b[0]

    B, T, C = x.shape
    xn = ln(x, p['ln1_w'], p['ln1_b'])
    scale = 1.0 / math.sqrt(dim_head)
    causal = jnp.tril(jnp.ones((T, T), bool))
    attn_out = jnp.zeros_like(x)
    for h in range(num_heads):
        q = xn @ p['wq'][h] + p['bq'][h]
        k = xn @ p['wk'][h] + p['bk'][h]
        v = xn @ p['wv'][h] + p['bv'][h]
        s = jnp.einsum('btd,bsd->bts', q, k) * scale
        s = jnp.where(causal[None], s, -1e30)
        pr = jax.nn.softmax(s, axis=-1)
        o = jnp.einsum('bts,bsd->btd', pr, v)
        attn_out = attn_out + o @ p['wo'][h]
    x1 = x + attn_out + p['bo'][0]
    xn2 = ln(x1, p['ln2_w'], p['ln2_b'])
    y = jnp.maximum(xn2 @ p['w1'] + p['b1'][0], 0.0) @ p['w2'] + p['b2'][0]
    return x1 + y


# ----------------------------- main -------------------------------------------

if __name__ == "__main__":
    # TransformerDecoder(num_heads=4, dim_embedding=32, dim_context=8,
    #                    dim_feedforward=64, prob_dropout=0.1)  [dropout = eval/identity]
    B, T, C, H, F = 2, 8, 32, 4, 64
    DH = C // H

    key = jax.random.PRNGKey(0)
    ks = jax.random.split(key, 16)
    s = 0.1
    params = {
        'ln1_w': jnp.ones((1, C), jnp.float32),
        'ln1_b': jnp.zeros((1, C), jnp.float32),
        'wq': jax.random.normal(ks[0], (H, C, DH), jnp.float32) * s,
        'bq': jax.random.normal(ks[1], (H, 1, DH), jnp.float32) * s,
        'wk': jax.random.normal(ks[2], (H, C, DH), jnp.float32) * s,
        'bk': jax.random.normal(ks[3], (H, 1, DH), jnp.float32) * s,
        'wv': jax.random.normal(ks[4], (H, C, DH), jnp.float32) * s,
        'bv': jax.random.normal(ks[5], (H, 1, DH), jnp.float32) * s,
        'wo': jax.random.normal(ks[6], (H, DH, C), jnp.float32) * s,
        'bo': jax.random.normal(ks[7], (1, C), jnp.float32) * s,
        'ln2_w': jnp.ones((1, C), jnp.float32),
        'ln2_b': jnp.zeros((1, C), jnp.float32),
        'w1': jax.random.normal(ks[8], (C, F), jnp.float32) * s,
        'b1': jax.random.normal(ks[9], (1, F), jnp.float32) * s,
        'w2': jax.random.normal(ks[10], (F, C), jnp.float32) * s,
        'b2': jax.random.normal(ks[11], (1, C), jnp.float32) * s,
    }

    x = jax.random.normal(ks[12], (B, T, C), jnp.float32)

    out = transformer_decoder(x, params, num_heads=H, dim_head=DH)
    out = jax.block_until_ready(out)

    ref = reference(x, params, num_heads=H, dim_head=DH)
    np.testing.assert_allclose(np.asarray(out), np.asarray(ref), rtol=2e-2, atol=2e-2)

    print("KERNEL_OK")
</pallas_src>

<mosaic_0001>
module attributes {stable_mosaic.version = 11 : i64} {
  func.func @decoder_kernel(%arg0: i32, %arg1: memref<1x8x128xbf16, #tpu.memory_space<vmem>>, %arg2: memref<128x1536xbf16, #tpu.memory_space<vmem>>, %arg3: memref<768x128xbf16, #tpu.memory_space<vmem>>, %arg4: memref<24x128xf32, #tpu.memory_space<vmem>>, %arg5: memref<1x8x128xf32, #tpu.memory_space<vmem>>) attributes {dimension_semantics = [#tpu.dimension_semantics<parallel>], iteration_bounds = array<i64: 2>, scalar_prefetch = 0 : i64, scratch_operands = 0 : i64, tpu.core_type = #tpu.core_type<tc>, window_params = [{transform_indices = @transform_0, window_bounds = array<i64: 1, 8, 128>}, {pipeline_mode = #tpu.pipeline_mode<synchronous>, transform_indices = @transform_1, window_bounds = array<i64: 128, 1536>}, {pipeline_mode = #tpu.pipeline_mode<synchronous>, transform_indices = @transform_2, window_bounds = array<i64: 768, 128>}, {pipeline_mode = #tpu.pipeline_mode<synchronous>, transform_indices = @transform_3, window_bounds = array<i64: 24, 128>}, {transform_indices = @transform_4, window_bounds = array<i64: 1, 8, 128>}]} {
    %c19 = arith.constant 19 : index
    %c0 = arith.constant 0 : index
    %0 = vector.load %arg4[%c19, %c0] : memref<24x128xf32, #tpu.memory_space<vmem>>, vector<1x128xf32>
    %c0_0 = arith.constant 0 : index
    %c0_1 = arith.constant 0 : index
    %c0_2 = arith.constant 0 : index
    %1 = vector.load %arg1[%c0_0, %c0_1, %c0_2] : memref<1x8x128xbf16, #tpu.memory_space<vmem>>, vector<1x8x128xbf16>
    %2 = vector.shape_cast %1 : vector<1x8x128xbf16> to vector<8x128xbf16>
    %3 = arith.extf %2 : vector<8x128xbf16> to vector<8x128xf32>
    %c0_3 = arith.constant 0 : index
    %c0_4 = arith.constant 0 : index
    %4 = vector.load %arg4[%c0_3, %c0_4] : memref<24x128xf32, #tpu.memory_space<vmem>>, vector<1x128xf32>
    %c1 = arith.constant 1 : index
    %c0_5 = arith.constant 0 : index
    %5 = vector.load %arg4[%c1, %c0_5] : memref<24x128xf32, #tpu.memory_space<vmem>>, vector<1x128xf32>
    %cst = arith.constant dense<0.000000e+00> : vector<8xf32>
    %6 = vector.multi_reduction <add>, %3, %cst [1] : vector<8x128xf32> to vector<8xf32>
    %7 = vector.shape_cast %6 : vector<8xf32> to vector<8x1xf32>
    %cst_6 = arith.constant 3.125000e-02 : f32
    %8 = vector.broadcast %cst_6 : f32 to vector<8x1xf32>
    %9 = arith.mulf %7, %8 : vector<8x1xf32>
    %10 = vector.broadcast %9 : vector<8x1xf32> to vector<8x128xf32>
    %11 = arith.subf %3, %10 : vector<8x128xf32>
    %12 = vector.broadcast %0 : vector<1x128xf32> to vector<8x128xf32>
    %13 = arith.mulf %11, %12 : vector<8x128xf32>
    %14 = arith.mulf %13, %13 : vector<8x128xf32>
    %cst_7 = arith.constant dense<0.000000e+00> : vector<8xf32>
    %15 = vector.multi_reduction <add>, %14, %cst_7 [1] : vector<8x128xf32> to vector<8xf32>
    %16 = vector.shape_cast %15 : vector<8xf32> to vector<8x1xf32>
    %cst_8 = arith.constant 3.125000e-02 : f32
    %17 = vector.broadcast %cst_8 : f32 to vector<8x1xf32>
    %18 = arith.mulf %16, %17 : vector<8x1xf32>
    %cst_9 = arith.constant 9.99999974E-6 : f32
    %19 = vector.broadcast %cst_9 : f32 to vector<8x1xf32>
    %20 = arith.addf %18, %19 : vector<8x1xf32>
    %21 = math.rsqrt %20 : vector<8x1xf32>
    %22 = vector.broadcast %21 : vector<8x1xf32> to vector<8x128xf32>
    %23 = arith.mulf %13, %22 : vector<8x128xf32>
    %24 = vector.broadcast %4 : vector<1x128xf32> to vector<8x128xf32>
    %25 = arith.mulf %23, %24 : vector<8x128xf32>
    %26 = vector.broadcast %5 : vector<1x128xf32> to vector<8x128xf32>
    %27 = arith.addf %25, %26 : vector<8x128xf32>
    %28 = arith.truncf %27 : vector<8x128xf32> to vector<8x128xbf16>
    %c0_10 = arith.constant 0 : index
    %c0_11 = arith.constant 0 : index
    %29 = vector.load %arg2[%c0_10, %c0_11] : memref<128x1536xbf16, #tpu.memory_space<vmem>>, vector<128x1536xbf16>
    %cst_12 = arith.constant dense<0.000000e+00> : vector<8x1536xf32>
    %30 = tpu.matmul %28, %29, %cst_12 {dimension_numbers = #tpu.dot_dimension_numbers<[1], [0], [0], [1], [0, 0, 1, 1], [], []>} : vector<8x128xbf16>, vector<128x1536xbf16>, vector<8x1536xf32> -> vector<8x1536xf32>
    %31 = tpu.iota {dimensions = array<i32: 0>} : vector<8x8xi32>
    %32 = tpu.iota {dimensions = array<i32: 1>} : vector<8x8xi32>
    %33 = arith.cmpi sge, %31, %32 : vector<8x8xi32>
    %cst_13 = arith.constant 0.000000e+00 : f32
    %cst_14 = arith.constant -1.000000e+30 : f32
    %34 = vector.broadcast %cst_13 : f32 to vector<8x8xf32>
    %35 = vector.broadcast %cst_14 : f32 to vector<8x8xf32>
    %36 = arith.select %33, %34, %35 : vector<8x8xi1>, vector<8x8xf32>
    %cst_15 = arith.constant 0.000000e+00 : f32
    %37 = vector.broadcast %cst_15 : f32 to vector<8x128xf32>
    %38 = vector.extract_strided_slice %30 {offsets = [0, 0], sizes = [8, 128], strides = [1, 1]} : vector<8x1536xf32> to vector<8x128xf32>
    %c2 = arith.constant 2 : index
    %c0_16 = arith.constant 0 : index
    %39 = vector.load %arg4[%c2, %c0_16] : memref<24x128xf32, #tpu.memory_space<vmem>>, vector<1x128xf32>
    %40 = vector.broadcast %39 : vector<1x128xf32> to vector<8x128xf32>
    %41 = arith.addf %38, %40 : vector<8x128xf32>
    %42 = arith.truncf %41 : vector<8x128xf32> to vector<8x128xbf16>
    %43 = vector.extract_strided_slice %30 {offsets = [0, 128], sizes = [8, 128], strides = [1, 1]} : vector<8x1536xf32> to vector<8x128xf32>
    %c3 = arith.constant 3 : index
    %c0_17 = arith.constant 0 : index
    %44 = vector.load %arg4[%c3, %c0_17] : memref<24x128xf32, #tpu.memory_space<vmem>>, vector<1x128xf32>
    %45 = vector.broadcast %44 : vector<1x128xf32> to vector<8x128xf32>
    %46 = arith.addf %43, %45 : vector<8x128xf32>
    %47 = arith.truncf %46 : vector<8x128xf32> to vector<8x128xbf16>
    %48 = vector.extract_strided_slice %30 {offsets = [0, 256], sizes = [8, 128], strides = [1, 1]} : vector<8x1536xf32> to vector<8x128xf32>
    %c4 = arith.constant 4 : index
    %c0_18 = arith.constant 0 : index
    %49 = vector.load %arg4[%c4, %c0_18] : memref<24x128xf32, #tpu.memory_space<vmem>>, vector<1x128xf32>
    %50 = vector.broadcast %49 : vector<1x128xf32> to vector<8x128xf32>
    %51 = arith.addf %48, %50 : vector<8x128xf32>
    %52 = arith.truncf %51 : vector<8x128xf32> to vector<8x128xbf16>
    %cst_19 = arith.constant dense<0.000000e+00> : vector<8x8xf32>
    %53 = tpu.matmul %42, %47, %cst_19 {dimension_numbers = #tpu.dot_dimension_numbers<[1], [1], [0], [0], [0, 0, 1, 0], [], []>} : vector<8x128xbf16>, vector<8x128xbf16>, vector<8x8xf32> -> vector<8x8xf32>
    %54 = arith.addf %53, %36 : vector<8x8xf32>
    %cst_20 = arith.constant dense<0xFF800000> : vector<8xf32>
    %55 = vector.multi_reduction <maximumf>, %54, %cst_20 [1] : vector<8x8xf32> to vector<8xf32>
    %56 = vector.shape_cast %55 : vector<8xf32> to vector<8x1xf32>
    %57 = vector.broadcast %56 : vector<8x1xf32> to vector<8x8xf32>
    %58 = arith.subf %54, %57 : vector<8x8xf32>
    %59 = math.exp %58 : vector<8x8xf32>
    %cst_21 = arith.constant dense<0.000000e+00> : vector<8xf32>
    %60 = vector.multi_reduction <add>, %59, %cst_21 [1] : vector<8x8xf32> to vector<8xf32>
    %61 = vector.shape_cast %60 : vector<8xf32> to vector<8x1xf32>
    %62 = tpu.reciprocal %61 {approx = true} : vector<8x1xf32> -> vector<8x1xf32>
    %63 = vector.broadcast %62 : vector<8x1xf32> to vector<8x8xf32>
    %64 = arith.mulf %59, %63 : vector<8x8xf32>
    %65 = arith.truncf %64 : vector<8x8xf32> to vector<8x8xbf16>
    %cst_22 = arith.constant dense<0.000000e+00> : vector<8x128xf32>
    %66 = tpu.matmul %65, %52, %cst_22 {dimension_numbers = #tpu.dot_dimension_numbers<[1], [0], [0], [1], [0, 0, 1, 1], [], []>} : vector<8x8xbf16>, vector<8x128xbf16>, vector<8x128xf32> -> vector<8x128xf32>
    %67 = arith.truncf %66 : vector<8x128xf32> to vector<8x128xbf16>
    %c0_23 = arith.constant 0 : index
    %c0_24 = arith.constant 0 : index
    %68 = vector.load %arg3[%c0_23, %c0_24] : memref<768x128xbf16, #tpu.memory_space<vmem>>, vector<128x128xbf16>
    %cst_25 = arith.constant dense<0.000000e+00> : vector<8x128xf32>
    %69 = tpu.matmul %67, %68, %cst_25 {dimension_numbers = #tpu.dot_dimension_numbers<[1], [0], [0], [1], [0, 0, 1, 1], [], []>} : vector<8x128xbf16>, vector<128x128xbf16>, vector<8x128xf32> -> vector<8x128xf32>
    %70 = arith.addf %37, %69 : vector<8x128xf32>
    %71 = vector.extract_strided_slice %30 {offsets = [0, 384], sizes = [8, 128], strides = [1, 1]} : vector<8x1536xf32> to vector<8x128xf32>
    %c5 = arith.constant 5 : index
    %c0_26 = arith.constant 0 : index
    %72 = vector.load %arg4[%c5, %c0_26] : memref<24x128xf32, #tpu.memory_space<vmem>>, vector<1x128xf32>
    %73 = vector.broadcast %72 : vector<1x128xf32> to vector<8x128xf32>
    %74 = arith.addf %71, %73 : vector<8x128xf32>
    %75 = arith.truncf %74 : vector<8x128xf32> to vector<8x128xbf16>
    %76 = vector.extract_strided_slice %30 {offsets = [0, 512], sizes = [8, 128], strides = [1, 1]} : vector<8x1536xf32> to vector<8x128xf32>
    %c6 = arith.constant 6 : index
    %c0_27 = arith.constant 0 : index
    %77 = vector.load %arg4[%c6, %c0_27] : memref<24x128xf32, #tpu.memory_space<vmem>>, vector<1x128xf32>
    %78 = vector.broadcast %77 : vector<1x128xf32> to vector<8x128xf32>
    %79 = arith.addf %76, %78 : vector<8x128xf32>
    %80 = arith.truncf %79 : vector<8x128xf32> to vector<8x128xbf16>
    %81 = vector.extract_strided_slice %30 {offsets = [0, 640], sizes = [8, 128], strides = [1, 1]} : vector<8x1536xf32> to vector<8x128xf32>
    %c7 = arith.constant 7 : index
    %c0_28 = arith.constant 0 : index
    %82 = vector.load %arg4[%c7, %c0_28] : memref<24x128xf32, #tpu.memory_space<vmem>>, vector<1x128xf32>
    %83 = vector.broadcast %82 : vector<1x128xf32> to vector<8x128xf32>
    %84 = arith.addf %81, %83 : vector<8x128xf32>
    %85 = arith.truncf %84 : vector<8x128xf32> to vector<8x128xbf16>
    %cst_29 = arith.constant dense<0.000000e+00> : vector<8x8xf32>
    %86 = tpu.matmul %75, %80, %cst_29 {dimension_numbers = #tpu.dot_dimension_numbers<[1], [1], [0], [0], [0, 0, 1, 0], [], []>} : vector<8x128xbf16>, vector<8x128xbf16>, vector<8x8xf32> -> vector<8x8xf32>
    %87 = arith.addf %86, %36 : vector<8x8xf32>
    %cst_30 = arith.constant dense<0xFF800000> : vector<8xf32>
    %88 = vector.multi_reduction <maximumf>, %87, %cst_30 [1] : vector<8x8xf32> to vector<8xf32>
    %89 = vector.shape_cast %88 : vector<8xf32> to vector<8x1xf32>
    %90 = vector.broadcast %89 : vector<8x1xf32> to vector<8x8xf32>
    %91 = arith.subf %87, %90 : vector<8x8xf32>
    %92 = math.exp %91 : vector<8x8xf32>
    %cst_31 = arith.constant dense<0.000000e+00> : vector<8xf32>
    %93 = vector.multi_reduction <add>, %92, %cst_31 [1] : vector<8x8xf32> to vector<8xf32>
    %94 = vector.shape_cast %93 : vector<8xf32> to vector<8x1xf32>
    %95 = tpu.reciprocal %94 {approx = true} : vector<8x1xf32> -> vector<8x1xf32>
    %96 = vector.broadcast %95 : vector<8x1xf32> to vector<8x8xf32>
    %97 = arith.mulf %92, %96 : vector<8x8xf32>
    %98 = arith.truncf %97 : vector<8x8xf32> to vector<8x8xbf16>
    %cst_32 = arith.constant dense<0.000000e+00> : vector<8x128xf32>
    %99 = tpu.matmul %98, %85, %cst_32 {dimension_numbers = #tpu.dot_dimension_numbers<[1], [0], [0], [1], [0, 0, 1, 1], [], []>} : vector<8x8xbf16>, vector<8x128xbf16>, vector<8x128xf32> -> vector<8x128xf32>
    %100 = arith.truncf %99 : vector<8x128xf32> to vector<8x128xbf16>
    %c128 = arith.constant 128 : index
    %c0_33 = arith.constant 0 : index
    %101 = vector.load %arg3[%c128, %c0_33] : memref<768x128xbf16, #tpu.memory_space<vmem>>, vector<128x128xbf16>
    %cst_34 = arith.constant dense<0.000000e+00> : vector<8x128xf32>
    %102 = tpu.matmul %100, %101, %cst_34 {dimension_numbers = #tpu.dot_dimension_numbers<[1], [0], [0], [1], [0, 0, 1, 1], [], []>} : vector<8x128xbf16>, vector<128x128xbf16>, vector<8x128xf32> -> vector<8x128xf32>
    %103 = arith.addf %70, %102 : vector<8x128xf32>
    %104 = vector.extract_strided_slice %30 {offsets = [0, 768], sizes = [8, 128], strides = [1, 1]} : vector<8x1536xf32> to vector<8x128xf32>
    %c8 = arith.constant 8 : index
    %c0_35 = arith.constant 0 : index
    %105 = vector.load %arg4[%c8, %c0_35] : memref<24x128xf32, #tpu.memory_space<vmem>>, vector<1x128xf32>
    %106 = vector.broadcast %105 : vector<1x128xf32> to vector<8x128xf32>
    %107 = arith.addf %104, %106 : vector<8x128xf32>
    %108 = arith.truncf %107 : vector<8x128xf32> to vector<8x128xbf16>
    %109 = vector.extract_strided_slice %30 {offsets = [0, 896], sizes = [8, 128], strides = [1, 1]} : vector<8x1536xf32> to vector<8x128xf32>
    %c9 = arith.constant 9 : index
    %c0_36 = arith.constant 0 : index
    %110 = vector.load %arg4[%c9, %c0_36] : memref<24x128xf32, #tpu.memory_space<vmem>>, vector<1x128xf32>
    %111 = vector.broadcast %110 : vector<1x128xf32> to vector<8x128xf32>
    %112 = arith.addf %109, %111 : vector<8x128xf32>
    %113 = arith.truncf %112 : vector<8x128xf32> to vector<8x128xbf16>
    %114 = vector.extract_strided_slice %30 {offsets = [0, 1024], sizes = [8, 128], strides = [1, 1]} : vector<8x1536xf32> to vector<8x128xf32>
    %c10 = arith.constant 10 : index
    %c0_37 = arith.constant 0 : index
    %115 = vector.load %arg4[%c10, %c0_37] : memref<24x128xf32, #tpu.memory_space<vmem>>, vector<1x128xf32>
    %116 = vector.broadcast %115 : vector<1x128xf32> to vector<8x128xf32>
    %117 = arith.addf %114, %116 : vector<8x128xf32>
    %118 = arith.truncf %117 : vector<8x128xf32> to vector<8x128xbf16>
    %cst_38 = arith.constant dense<0.000000e+00> : vector<8x8xf32>
    %119 = tpu.matmul %108, %113, %cst_38 {dimension_numbers = #tpu.dot_dimension_numbers<[1], [1], [0], [0], [0, 0, 1, 0], [], []>} : vector<8x128xbf16>, vector<8x128xbf16>, vector<8x8xf32> -> vector<8x8xf32>
    %120 = arith.addf %119, %36 : vector<8x8xf32>
    %cst_39 = arith.constant dense<0xFF800000> : vector<8xf32>
    %121 = vector.multi_reduction <maximumf>, %120, %cst_39 [1] : vector<8x8xf32> to vector<8xf32>
    %122 = vector.shape_cast %121 : vector<8xf32> to vector<8x1xf32>
    %123 = vector.broadcast %122 : vector<8x1xf32> to vector<8x8xf32>
    %124 = arith.subf %120, %123 : vector<8x8xf32>
    %125 = math.exp %124 : vector<8x8xf32>
    %cst_40 = arith.constant dense<0.000000e+00> : vector<8xf32>
    %126 = vector.multi_reduction <add>, %125, %cst_40 [1] : vector<8x8xf32> to vector<8xf32>
    %127 = vector.shape_cast %126 : vector<8xf32> to vector<8x1xf32>
    %128 = tpu.reciprocal %127 {approx = true} : vector<8x1xf32> -> vector<8x1xf32>
    %129 = vector.broadcast %128 : vector<8x1xf32> to vector<8x8xf32>
    %130 = arith.mulf %125, %129 : vector<8x8xf32>
    %131 = arith.truncf %130 : vector<8x8xf32> to vector<8x8xbf16>
    %cst_41 = arith.constant dense<0.000000e+00> : vector<8x128xf32>
    %132 = tpu.matmul %131, %118, %cst_41 {dimension_numbers = #tpu.dot_dimension_numbers<[1], [0], [0], [1], [0, 0, 1, 1], [], []>} : vector<8x8xbf16>, vector<8x128xbf16>, vector<8x128xf32> -> vector<8x128xf32>
    %133 = arith.truncf %132 : vector<8x128xf32> to vector<8x128xbf16>
    %c256 = arith.constant 256 : index
    %c0_42 = arith.constant 0 : index
    %134 = vector.load %arg3[%c256, %c0_42] : memref<768x128xbf16, #tpu.memory_space<vmem>>, vector<128x128xbf16>
    %cst_43 = arith.constant dense<0.000000e+00> : vector<8x128xf32>
    %135 = tpu.matmul %133, %134, %cst_43 {dimension_numbers = #tpu.dot_dimension_numbers<[1], [0], [0], [1], [0, 0, 1, 1], [], []>} : vector<8x128xbf16>, vector<128x128xbf16>, vector<8x128xf32> -> vector<8x128xf32>
    %136 = arith.addf %103, %135 : vector<8x128xf32>
    %137 = vector.extract_strided_slice %30 {offsets = [0, 1152], sizes = [8, 128], strides = [1, 1]} : vector<8x1536xf32> to vector<8x128xf32>
    %c11 = arith.constant 11 : index
    %c0_44 = arith.constant 0 : index
    %138 = vector.load %arg4[%c11, %c0_44] : memref<24x128xf32, #tpu.memory_space<vmem>>, vector<1x128xf32>
    %139 = vector.broadcast %138 : vector<1x128xf32> to vector<8x128xf32>
    %140 = arith.addf %137, %139 : vector<8x128xf32>
    %141 = arith.truncf %140 : vector<8x128xf32> to vector<8x128xbf16>
    %142 = vector.extract_strided_slice %30 {offsets = [0, 1280], sizes = [8, 128], strides = [1, 1]} : vector<8x1536xf32> to vector<8x128xf32>
    %c12 = arith.constant 12 : index
    %c0_45 = arith.constant 0 : index
    %143 = vector.load %arg4[%c12, %c0_45] : memref<24x128xf32, #tpu.memory_space<vmem>>, vector<1x128xf32>
    %144 = vector.broadcast %143 : vector<1x128xf32> to vector<8x128xf32>
    %145 = arith.addf %142, %144 : vector<8x128xf32>
    %146 = arith.truncf %145 : vector<8x128xf32> to vector<8x128xbf16>
    %147 = vector.extract_strided_slice %30 {offsets = [0, 1408], sizes = [8, 128], strides = [1, 1]} : vector<8x1536xf32> to vector<8x128xf32>
    %c13 = arith.constant 13 : index
    %c0_46 = arith.constant 0 : index
    %148 = vector.load %arg4[%c13, %c0_46] : memref<24x128xf32, #tpu.memory_space<vmem>>, vector<1x128xf32>
    %149 = vector.broadcast %148 : vector<1x128xf32> to vector<8x128xf32>
    %150 = arith.addf %147, %149 : vector<8x128xf32>
    %151 = arith.truncf %150 : vector<8x128xf32> to vector<8x128xbf16>
    %cst_47 = arith.constant dense<0.000000e+00> : vector<8x8xf32>
    %152 = tpu.matmul %141, %146, %cst_47 {dimension_numbers = #tpu.dot_dimension_numbers<[1], [1], [0], [0], [0, 0, 1, 0], [], []>} : vector<8x128xbf16>, vector<8x128xbf16>, vector<8x8xf32> -> vector<8x8xf32>
    %153 = arith.addf %152, %36 : vector<8x8xf32>
    %cst_48 = arith.constant dense<0xFF800000> : vector<8xf32>
    %154 = vector.multi_reduction <maximumf>, %153, %cst_48 [1] : vector<8x8xf32> to vector<8xf32>
    %155 = vector.shape_cast %154 : vector<8xf32> to vector<8x1xf32>
    %156 = vector.broadcast %155 : vector<8x1xf32> to vector<8x8xf32>
    %157 = arith.subf %153, %156 : vector<8x8xf32>
    %158 = math.exp %157 : vector<8x8xf32>
    %cst_49 = arith.constant dense<0.000000e+00> : vector<8xf32>
    %159 = vector.multi_reduction <add>, %158, %cst_49 [1] : vector<8x8xf32> to vector<8xf32>
    %160 = vector.shape_cast %159 : vector<8xf32> to vector<8x1xf32>
    %161 = tpu.reciprocal %160 {approx = true} : vector<8x1xf32> -> vector<8x1xf32>
    %162 = vector.broadcast %161 : vector<8x1xf32> to vector<8x8xf32>
    %163 = arith.mulf %158, %162 : vector<8x8xf32>
    %164 = arith.truncf %163 : vector<8x8xf32> to vector<8x8xbf16>
    %cst_50 = arith.constant dense<0.000000e+00> : vector<8x128xf32>
    %165 = tpu.matmul %164, %151, %cst_50 {dimension_numbers = #tpu.dot_dimension_numbers<[1], [0], [0], [1], [0, 0, 1, 1], [], []>} : vector<8x8xbf16>, vector<8x128xbf16>, vector<8x128xf32> -> vector<8x128xf32>
    %166 = arith.truncf %165 : vector<8x128xf32> to vector<8x128xbf16>
    %c384 = arith.constant 384 : index
    %c0_51 = arith.constant 0 : index
    %167 = vector.load %arg3[%c384, %c0_51] : memref<768x128xbf16, #tpu.memory_space<vmem>>, vector<128x128xbf16>
    %cst_52 = arith.constant dense<0.000000e+00> : vector<8x128xf32>
    %168 = tpu.matmul %166, %167, %cst_52 {dimension_numbers = #tpu.dot_dimension_numbers<[1], [0], [0], [1], [0, 0, 1, 1], [], []>} : vector<8x128xbf16>, vector<128x128xbf16>, vector<8x128xf32> -> vector<8x128xf32>
    %169 = arith.addf %136, %168 : vector<8x128xf32>
    %170 = arith.addf %3, %169 : vector<8x128xf32>
    %c14 = arith.constant 14 : index
    %c0_53 = arith.constant 0 : index
    %171 = vector.load %arg4[%c14, %c0_53] : memref<24x128xf32, #tpu.memory_space<vmem>>, vector<1x128xf32>
    %172 = vector.broadcast %171 : vector<1x128xf32> to vector<8x128xf32>
    %173 = arith.addf %170, %172 : vector<8x128xf32>
    %c15 = arith.constant 15 : index
    %c0_54 = arith.constant 0 : index
    %174 = vector.load %arg4[%c15, %c0_54] : memref<24x128xf32, #tpu.memory_space<vmem>>, vector<1x128xf32>
    %c16 = arith.constant 16 : index
    %c0_55 = arith.constant 0 : index
    %175 = vector.load %arg4[%c16, %c0_55] : memref<24x128xf32, #tpu.memory_space<vmem>>, vector<1x128xf32>
    %cst_56 = arith.constant dense<0.000000e+00> : vector<8xf32>
    %176 = vector.multi_reduction <add>, %173, %cst_56 [1] : vector<8x128xf32> to vector<8xf32>
    %177 = vector.shape_cast %176 : vector<8xf32> to vector<8x1xf32>
    %cst_57 = arith.constant 3.125000e-02 : f32
    %178 = vector.broadcast %cst_57 : f32 to vector<8x1xf32>
    %179 = arith.mulf %177, %178 : vector<8x1xf32>
    %180 = vector.broadcast %179 : vector<8x1xf32> to vector<8x128xf32>
    %181 = arith.subf %173, %180 : vector<8x128xf32>
    %182 = vector.broadcast %0 : vector<1x128xf32> to vector<8x128xf32>
    %183 = arith.mulf %181, %182 : vector<8x128xf32>
    %184 = arith.mulf %183, %183 : vector<8x128xf32>
    %cst_58 = arith.constant dense<0.000000e+00> : vector<8xf32>
    %185 = vector.multi_reduction <add>, %184, %cst_58 [1] : vector<8x128xf32> to vector<8xf32>
    %186 = vector.shape_cast %185 : vector<8xf32> to vector<8x1xf32>
    %cst_59 = arith.constant 3.125000e-02 : f32
    %187 = vector.broadcast %cst_59 : f32 to vector<8x1xf32>
    %188 = arith.mulf %186, %187 : vector<8x1xf32>
    %cst_60 = arith.constant 9.99999974E-6 : f32
    %189 = vector.broadcast %cst_60 : f32 to vector<8x1xf32>
    %190 = arith.addf %188, %189 : vector<8x1xf32>
    %191 = math.rsqrt %190 : vector<8x1xf32>
    %192 = vector.broadcast %191 : vector<8x1xf32> to vector<8x128xf32>
    %193 = arith.mulf %183, %192 : vector<8x128xf32>
    %194 = vector.broadcast %174 : vector<1x128xf32> to vector<8x128xf32>
    %195 = arith.mulf %193, %194 : vector<8x128xf32>
    %196 = vector.broadcast %175 : vector<1x128xf32> to vector<8x128xf32>
    %197 = arith.addf %195, %196 : vector<8x128xf32>
    %198 = arith.truncf %197 : vector<8x128xf32> to vector<8x128xbf16>
    %c512 = arith.constant 512 : index
    %c0_61 = arith.constant 0 : index
    %199 = vector.load %arg3[%c512, %c0_61] : memref<768x128xbf16, #tpu.memory_space<vmem>>, vector<128x128xbf16>
    %cst_62 = arith.constant dense<0.000000e+00> : vector<8x128xf32>
    %200 = tpu.matmul %198, %199, %cst_62 {dimension_numbers = #tpu.dot_dimension_numbers<[1], [0], [0], [1], [0, 0, 1, 1], [], []>} : vector<8x128xbf16>, vector<128x128xbf16>, vector<8x128xf32> -> vector<8x128xf32>
    %c17 = arith.constant 17 : index
    %c0_63 = arith.constant 0 : index
    %201 = vector.load %arg4[%c17, %c0_63] : memref<24x128xf32, #tpu.memory_space<vmem>>, vector<1x128xf32>
    %202 = vector.broadcast %201 : vector<1x128xf32> to vector<8x128xf32>
    %203 = arith.addf %200, %202 : vector<8x128xf32>
    %cst_64 = arith.constant 0.000000e+00 : f32
    %204 = vector.broadcast %cst_64 : f32 to vector<8x128xf32>
    %205 = arith.maximumf %203, %204 : vector<8x128xf32>
    %206 = arith.truncf %205 : vector<8x128xf32> to vector<8x128xbf16>
    %c640 = arith.constant 640 : index
    %c0_65 = arith.constant 0 : index
    %207 = vector.load %arg3[%c640, %c0_65] : memref<768x128xbf16, #tpu.memory_space<vmem>>, vector<128x128xbf16>
    %cst_66 = arith.constant dense<0.000000e+00> : vector<8x128xf32>
    %208 = tpu.matmul %206, %207, %cst_66 {dimension_numbers = #tpu.dot_dimension_numbers<[1], [0], [0], [1], [0, 0, 1, 1], [], []>} : vector<8x128xbf16>, vector<128x128xbf16>, vector<8x128xf32> -> vector<8x128xf32>
    %c18 = arith.constant 18 : index
    %c0_67 = arith.constant 0 : index
    %209 = vector.load %arg4[%c18, %c0_67] : memref<24x128xf32, #tpu.memory_space<vmem>>, vector<1x128xf32>
    %210 = vector.broadcast %209 : vector<1x128xf32> to vector<8x128xf32>
    %211 = arith.addf %208, %210 : vector<8x128xf32>
    %212 = arith.addf %173, %211 : vector<8x128xf32>
    %c0_68 = arith.constant 0 : index
    %c0_69 = arith.constant 0 : index
    %c0_70 = arith.constant 0 : index
    %213 = vector.load %arg5[%c0_68, %c0_69, %c0_70] : memref<1x8x128xf32, #tpu.memory_space<vmem>>, vector<1x8x128xf32>
    %214 = vector.shape_cast %213 : vector<1x8x128xf32> to vector<8x128xf32>
    %215 = vector.shape_cast %212 : vector<8x128xf32> to vector<1x8x128xf32>
    tpu.vector_store %arg5[%c0_68, %c0_69, %c0_70], %215 {strides = array<i32>} : memref<1x8x128xf32, #tpu.memory_space<vmem>>, vector<1x8x128xf32>,
    return
  }
  func.func @transform_0(%arg0: i32) -> (i32, i32, i32) {
    %c0_i32 = arith.constant 0 : i32
    %c0_i32_0 = arith.constant 0 : i32
    %c0_i32_1 = arith.constant 0 : i32
    return %arg0, %c0_i32, %c0_i32_0 : i32, i32, i32
  }
  func.func @transform_1(%arg0: i32) -> (i32, i32) {
    %c0_i32 = arith.constant 0 : i32
    %c0_i32_0 = arith.constant 0 : i32
    %c0_i32_1 = arith.constant 0 : i32
    return %c0_i32, %c0_i32_0 : i32, i32
  }
  func.func @transform_2(%arg0: i32) -> (i32, i32) {
    %c0_i32 = arith.constant 0 : i32
    %c0_i32_0 = arith.constant 0 : i32
    %c0_i32_1 = arith.constant 0 : i32
    return %c0_i32, %c0_i32_0 : i32, i32
  }
  func.func @transform_3(%arg0: i32) -> (i32, i32) {
    %c0_i32 = arith.constant 0 : i32
    %c0_i32_0 = arith.constant 0 : i32
    %c0_i32_1 = arith.constant 0 : i32
    return %c0_i32, %c0_i32_0 : i32, i32
  }
  func.func @transform_4(%arg0: i32) -> (i32, i32, i32) {
    %c0_i32 = arith.constant 0 : i32
    %c0_i32_0 = arith.constant 0 : i32
    %c0_i32_1 = arith.constant 0 : i32
    return %arg0, %c0_i32, %c0_i32_0 : i32, i32, i32
  }
}

</mosaic_0001>

<bundles_post_ra>
// kernel: tpu_custom_call.1
= control target key start
LH: loop header
LB: loop body
LE: loop exit
PB: predicated region body
PF: predicated region fallthrough
CT: control target
= control target key end

     0   :  { %9 = vsyncpa [#allocation3], 0  ;;  %s3685_s0 = inlined_call_operand.hbm [shape: bf16[2,8,128], index: 0, kind: input, shape index: {}]   ;;  %s3686_s1 = inlined_call_operand.hbm [shape: bf16[128,1536], index: 1, kind: input, shape index: {}]   ;;  %s3687_s2 = inlined_call_operand.hbm [shape: bf16[768,128], index: 2, kind: input, shape index: {}]   ;;  %s3688_s3 = inlined_call_operand.hbm [shape: f32[24,128], index: 3, kind: input, shape index: {}]   ;;  %s3689_s4 = inlined_call_operand.hbm [shape: f32[2,8,128], index: 4, kind: output, shape index: {}]  }
   0x1   :  { %11 = vsyncpa [#allocation3 + $0x1], 0 }
   0x2   :  { %12 = vsyncpa [#allocation6], 0 }
   0x3   :  { %13 = vsyncpa [#allocation9], 0 }
   0x4   :  { %14 = vsyncpa [#allocation4], 0 }
   0x5   :  { %16 = vsyncpa [#allocation4 + $0x1], 0  ;;  %s3329_s15 = smov 0   ;;  %s3331_s16 = smov 0  }
   0x6   :  { %s3333_s17 = smov 0   ;;  %s3335_s18 = smov 0  }
   0x7 LB: > { %s3350_s19 = sadd.s32 4294967295, %s3287_s18   ;;  %s2385_s20 = sadd.s32 4294967294, %s3287_s18   ;;  %s3287_s18 = sphi %s3335_s18, %s3713_s18   ;;  %s3283_s17 = sphi %s3333_s17, %s3712_s17   ;;  %s3279_s16 = sphi %s3331_s16, %s3711_s16   ;;  %s3275_s15 = sphi %s3329_s15, %s3710_s15  }
   0x8   : > { %p42_p0 = scmp.ne.s32.totalorder %s3279_s16, %s3275_s15  ;;  %p3690_p1 = scmp.eq.s32.totalorder %s3350_s19, 0 }
   0x9   : > { %p135_p3 = scmp.eq.s32.totalorder %s2385_s20, 1  ;;  %p2386_p5 = scmp.ge.s32.totalorder %s3287_s18, 1 }
   0xa   : > { %p3359_p4 = por %p3690_p1, %p42_p0  ;;  %p142_p7 = scmp.lt.s32.totalorder %s3287_s18, 3 }
   0xb   : > { %p3364_p6 = por %p135_p3, %p42_p0  ;;  %s3289_s24 = smov [#allocation5]  }
   0xc   : > { %s3694_s21 = scalar_select %p3359_p4, 1, 0 }
   0xd   : > { %s3695_s22 = scalar_select %p3364_p6, 1, 0 }
   0xe   : > { %p3369_p8 = pnand %p2386_p5, %p142_p7  ;;  %s154_s25 = sshll.u32 %s3289_s24, 4  ;;  %s155_s25 = int_to_ptr.vmem [resolvable:$true] %s154_s25 }
   0xf   : > { %s3290_s27 = smov [#allocation7]   ;;  %s3120_s29 = scalar_lea.vmem %s155_s25, 12288 }
  0x10   : > { %s3696_s23 = scalar_select %p3369_p8, 1, 0 }
  0x11   : > { %p2825_p9 = pneg %p3369_p8  ;;  %s167_s28 = sshll.u32 %s3290_s27, 4  ;;  %s168_s28 = int_to_ptr.vmem [resolvable:$true] %s167_s28 }
  0x12   : > { %p3121_p13 = scmp.ne.s32.totalorder %s155_s25, %s3120_s29  ;;  %p3128_p5 = scmp.lt.s32.totalorder %s155_s25, %s155_s25 }
  0x13   : > { %p3378_p11 = pnand %p2825_p9, %p3690_p1  ;;  %p3129_p7 = scmp.lt.s32.totalorder %s3120_s29, %s3120_s29 }
  0x15   : > { %p3111_p12 = pneg %p3378_p11  ;;  %p3130_p10 = por %p3129_p7, %p3128_p5 }
  0x17   : > { %p3123_p0 = pnand %p3121_p13, %p3111_p12 }
  0x19   : > { %p3124_p3 = pneg %p3123_p0 }
  0x1b   : > { %p3131_p9 = pnand %p3130_p10, %p3124_p3 }
  0x1d   : > { %3134 = shalt.err (!%p3131_p9)
}
  0x1e   : > { %s3291_s30 = smov 768   ;;  %s3292_s5 = smov 48  }
  0x1f   : > { %2828 = dma.hbm_to_vmem [thread:$0]  (!%p3378_p11), %s3686_s1, 12288, %s155_s25, [#allocation6], %s3291_s30, %s3291_s30, %s3292_s5  }
  0x20   : > { %s3146_s8 = scalar_lea.vmem %s168_s28, 6144  ;;  %p3154_p2 = scmp.lt.s32.totalorder %s168_s28, %s168_s28 }
  0x21   : > { %p3147_p1 = scmp.ne.s32.totalorder %s168_s28, %s3146_s8  ;;  %p3155_p6 = scmp.lt.s32.totalorder %s3146_s8, %s3146_s8 }
  0x23   : > { %p3149_p13 = pnand %p3147_p1, %p3111_p12  ;;  %p3156_p5 = por %p3155_p6, %p3154_p2 }
  0x25   : > { %p3150_p0 = pneg %p3149_p13 }
  0x27   : > { %p3157_p10 = pnand %p3156_p5, %p3150_p0 }
  0x29   : > { %3160 = shalt.err (!%p3157_p10)
}
  0x2a   : > { %s3293_s9 = smov 64   ;;  %s3294_s10 = smov 4  }
  0x2b   : > { %2831 = dma.hbm_to_vmem [thread:$0]  (!%p3378_p11), %s3687_s2, 6144, %s168_s28, [#allocation6], %s3293_s9, %s3293_s9, %s3294_s10  }
  0x2c   : > { %s3295_s13 = smov [#allocation8]  }
  0x2d   : > { %s180_s14 = sshll.u32 %s3295_s13, 4  ;;  %s181_s14 = int_to_ptr.vmem [resolvable:$true] %s180_s14 }
  0x2e   : > { %s3172_s20 = scalar_lea.vmem %s181_s14, 384  ;;  %p3180_p6 = scmp.lt.s32.totalorder %s181_s14, %s181_s14 }
  0x2f   : > { %p3173_p1 = scmp.ne.s32.totalorder %s181_s14, %s3172_s20  ;;  %p3181_p7 = scmp.lt.s32.totalorder %s3172_s20, %s3172_s20 }
  0x31   : > { %p3175_p3 = pnand %p3173_p1, %p3111_p12  ;;  %p3182_p9 = por %p3181_p7, %p3180_p6 }
  0x33   : > { %p3176_p2 = pneg %p3175_p3 }
  0x35   : > { %p3183_p13 = pnand %p3182_p9, %p3176_p2 }
  0x37   : > { %3186 = shalt.err (!%p3183_p13)
}
  0x38   : > { %s3296_s24 = smov 128   ;;  %s3297_s25 = smov 8  }
  0x39   : > { %2834 = dma.hbm_to_vmem [thread:$0]  (!%p3378_p11), %s3688_s3, 384, %s181_s14, [#allocation9], %s3296_s24, %s3296_s24, %s3297_s25  }
  0x3a   : > { %s3409_s29 = sadd.s32 1, %s3287_s18   ;;  %s29_s5 = sadd.s32 1, %s3283_s17 }
  0x3b   : > { %s26_s30 = ssub.s32 %s3287_s18, %s3409_s29  ;;  %p36_p0 = scmp.ne.s32.totalorder %s3283_s17, %s3279_s16 }
  0x3c   : > { %p27_p12 = scmp.eq.s32.totalorder %s26_s30, 0  ;;  %p37_p5 = scmp.eq.s32.totalorder %s3287_s18, 0 }
  0x3d   : > { %p2846_p10 = scmp.lt.s32.totalorder %s3287_s18, 2  ;;  %p3698_p3 = scmp.eq.s32.totalorder %s3350_s19, 1 }
  0x3e   : > { %s3419_s6 = scalar_select %p27_p12, %s3283_s17, %s29_s5  }
  0x3f   : > { %p38_p1 = por %p37_p5, %p36_p0  ;;  %p3423_p2 = por %p3698_p3, %p36_p0 }
  0x40   : > { %s194_s26 = sand.u32 1, %s3283_s17   ;;  %s2392_s8 = sshll.u32 %s3287_s18, 6 }
  0x41   : > { %s3699_s7 = scalar_select %p3423_p2, 1, 0 }
  0x42   : > { %s2391_s9 = sshll.u32 %s194_s26, 2  ;;  %s3432_s12 = scalar_lea.hbm %s3685_s0, %s2392_s8 }
  0x43   : > { %s198_s13 = scalar_lea.vmem [#allocation2], %s2391_s9  ;;  %p3434_p11 = pnand %p2846_p10, %p38_p1 }
  0x44   : > { %s205_s14 = sshll.u32 %s198_s13, 4  ;;  %s195_s24 = scalar_lea.sflag [#allocation3], %s194_s26  ;;  %s206_s14 = int_to_ptr.vmem [resolvable:$true] %s205_s14 }
  0x45   : > { %s3187_s25 = scalar_lea.hbm %s3432_s12, 64  ;;  %p3189_p7 = pneg %p3434_p11 }
  0x46   : > { %p3188_p6 = scmp.ne.s32.totalorder %s3432_s12, %s3187_s25  ;;  %s3192_s30 = scalar_lea.hbm %s3685_s0, 128 }
  0x47   : > { %p3193_p12 = scmp.lt.s32.totalorder %s3432_s12, %s3685_s0  ;;  %p3194_p0 = scmp.lt.s32.totalorder %s3192_s30, %s3187_s25 }
  0x48   : > { %p3190_p9 = pnand %p3189_p7, %p3188_p6 }
  0x49   : > { %p3195_p5 = por %p3194_p0, %p3193_p12 }
  0x4a   : > { %p3191_p13 = pneg %p3190_p9 }
  0x4c   : > { %p3196_p10 = pnand %p3195_p5, %p3191_p13 }
  0x4e   : > { %3199 = shalt.err (!%p3196_p10)
}
  0x4f   : > { %s3200_s9 = scalar_lea.vmem %s206_s14, 64  ;;  %s3298_s26 = smov [#allocation2]  }
  0x50   : > { %p3201_p1 = scmp.ne.s32.totalorder %s206_s14, %s3200_s9  ;;  %s3205_s10 = sshll.u32 %s3298_s26, 4  ;;  %s3206_s10 = int_to_ptr.vmem [resolvable:$false] %s3205_s10 }
  0x51   : > { %s3207_s11 = scalar_lea.vmem %s3206_s10, 128  ;;  %p3208_p6 = scmp.lt.s32.totalorder %s206_s14, %s3206_s10 }
  0x52   : > { %p3203_p3 = pnand %p3201_p1, %p3189_p7  ;;  %p3209_p9 = scmp.lt.s32.totalorder %s3207_s11, %s3200_s9 }
  0x54   : > { %p3204_p2 = pneg %p3203_p3  ;;  %p3210_p4 = por %p3209_p9, %p3208_p6 }
  0x56   : > { %p3211_p8 = pnand %p3210_p4, %p3204_p2 }
  0x58   : > { %3214 = shalt.err (!%p3211_p8)
}
  0x59   : > { %2838 = dma.hbm_to_vmem [thread:$0]  (!%p3434_p11), %s3432_s12, 64, %s206_s14, %s195_s24  }
  0x5a   : > { %p3701_p13 = scmp.ne.s32.totalorder %s3696_s23, 0 }
  0x5b   : > { %s3455_s13 = sand.u32 (!%p3701_p13), 1, %s3279_s16   ;;  %p3702_p7 = scmp.ne.s32.totalorder (!%p3701_p13), %s3694_s21, 0 }
  0x5c   : > { %214 = sbr.rel (%p3701_p13) target bundleno = 3992 (0xf98), region = 36  ;;  %s2394_s25 = sshll.u32 (!%p3701_p13), %s3455_s13, 2 }
  0x5d   : > { %s217_s27 = scalar_lea.sflag (!%p3701_p13), [#allocation3], %s3455_s13  ;;  %s220_s28 = scalar_lea.vmem (!%p3701_p13), [#allocation2], %s2394_s25 }
  0x61   : > { %3258 = dma.done.wait (%p3702_p7), %s217_s27, 64  }
  0x62   : > { %3260 = vsyncadd (%p3702_p7), %s217_s27, 4294967232  ;;  %p3703_p4 = scmp.eq.s32.totalorder %s3350_s19, 0 }
  0x64   : > { %3262 = dma.done.wait (%p3703_p4), [#allocation6], 18432   ;;  %p3704_p8 = pmov %p3703_p4 }
  0x65   : > { %p3705_p2 = pmov %p3703_p4 }
  0x66   : > { %3264 = vsyncadd (%p3704_p8), [#allocation6], 4294948864 }
  0x67   : > { %3266 = dma.done.wait (%p3705_p2), [#allocation9], 384   ;;  %p3706_p11 = pmov %p3705_p2 }
  0x68   : > { %v259_v0 = vld [vmem:[%s220_s28] sm:$0xf]  ;;  %v2896_v2 = vld [vmem:[#allocation5 + $0x2a4] ss:$48 sps:$4 sm:$0xff]   ;;  %v2900_v4 = vld [vmem:[#allocation5 + $0x2a0] ss:$48 sps:$4 sm:$0xff]  }
  0x69   : > { %3268 = vsyncadd (%p3706_p11), [#allocation9], 4294966912  ;;  %v3471_v1 = vunpack.c.l.bf16 %v259_v0  ;;  %v2898_v3 = vld [vmem:[#allocation5 + $0x2ac] ss:$48 sps:$4 sm:$0xff]   ;;  %v2901_v5 = vld [vmem:[#allocation5 + $0x2a8] ss:$48 sps:$4 sm:$0xff]   ;;  %866 = vmatprep.subr.bf16.mxu0 %v2896_v2 }
  0x6a   : > { %v2902_v6 = vld [vmem:[#allocation5 + $0x244] ss:$48 sps:$4 sm:$0xff]   ;;  %v2904_v7 = vld [vmem:[#allocation5 + $0x24c] ss:$48 sps:$4 sm:$0xff]   ;;  %907 = vmatprep.subr.bf16.mxu1 %v2898_v3  ;;  %v2906_v8 = vld [vmem:[#allocation5 + $0x240] ss:$48 sps:$4 sm:$0xff]   ;;  %867 = vmatpush1.bf16.msra.mxu0 %v2900_v4 }
  0x6b   : > { %263 = vadd.xlane.f32.xlu0 %v3471_v1  ;;  %v2907_v9 = vld [vmem:[#allocation5 + $0x248] ss:$48 sps:$4 sm:$0xff]   ;;  %908 = vmatpush1.bf16.msra.mxu1 %v2901_v5  ;;  %v2399_v12 = vld [vmem:[#allocation8 + $0x13] ss:$0 sm:$0xff]  ;;  %v2908_v16 = vld [vmem:[#allocation5 + $0x1e4] ss:$48 sps:$4 sm:$0xff]  }
  0x6c   : > { %868 = vmatprep.subr.bf16.mxu0 %v2902_v6  ;;  %909 = vmatprep.subr.bf16.mxu1 %v2904_v7  ;;  %v2910_v17 = vld [vmem:[#allocation5 + $0x1ec] ss:$48 sps:$4 sm:$0xff]   ;;  %v2912_v18 = vld [vmem:[#allocation5 + $0x1e0] ss:$48 sps:$4 sm:$0xff]   ;;  %v2913_v19 = vld [vmem:[#allocation5 + $0x1e8] ss:$48 sps:$4 sm:$0xff]  }
  0x6d   : > { %v2914_v20 = vld [vmem:[#allocation5 + $0x184] ss:$48 sps:$4 sm:$0xff]   ;;  %v2916_v21 = vld [vmem:[#allocation5 + $0x18c] ss:$48 sps:$4 sm:$0xff]   ;;  %v2918_v22 = vld [vmem:[#allocation5 + $0x180] ss:$48 sps:$4 sm:$0xff]  }
  0x6e   : > { %869 = vmatpush1.bf16.msra.mxu0 %v2906_v8  ;;  %v2919_v23 = vld [vmem:[#allocation5 + $0x188] ss:$48 sps:$4 sm:$0xff]   ;;  %v2920_v24 = vld [vmem:[#allocation5 + $0x124] ss:$48 sps:$4 sm:$0xff]   ;;  %v2922_v25 = vld [vmem:[#allocation5 + $0x12c] ss:$48 sps:$4 sm:$0xff]  }
  0x6f   : > { %910 = vmatpush1.bf16.msra.mxu1 %v2907_v9  ;;  %870 = vmatprep.subr.bf16.mxu0 %v2908_v16  ;;  %v2924_v26 = vld [vmem:[#allocation5 + $0x120] ss:$48 sps:$4 sm:$0xff]   ;;  %v2925_v27 = vld [vmem:[#allocation5 + $0x128] ss:$48 sps:$4 sm:$0xff]   ;;  %v2926_v28 = vld [vmem:[#allocation5 + $0xc4] ss:$48 sps:$4 sm:$0xff]  }
  0x70   : > { %911 = vmatprep.subr.bf16.mxu1 %v2910_v17  ;;  %v2928_v29 = vld [vmem:[#allocation5 + $0xcc] ss:$48 sps:$4 sm:$0xff]   ;;  %v2930_v30 = vld [vmem:[#allocation5 + $0xc0] ss:$48 sps:$4 sm:$0xff]   ;;  %v2931_v31 = vld [vmem:[#allocation5 + $0xc8] ss:$48 sps:$4 sm:$0xff]  }
  0x71   : > { %v2932_v32 = vld [vmem:[#allocation5 + $0x64] ss:$48 sps:$4 sm:$0xff]   ;;  %v2934_v33 = vld [vmem:[#allocation5 + $0x6c] ss:$48 sps:$4 sm:$0xff]   ;;  %v2936_v34 = vld [vmem:[#allocation5 + $0x60] ss:$48 sps:$4 sm:$0xff]  }
  0x72   : > { %871 = vmatpush1.bf16.msra.mxu0 %v2912_v18  ;;  %v2937_v35 = vld [vmem:[#allocation5 + $0x68] ss:$48 sps:$4 sm:$0xff]   ;;  %v2938_v36 = vld [vmem:[#allocation5 + $0x4] ss:$48 sps:$4 sm:$0xff]   ;;  %v2940_v37 = vld [vmem:[#allocation5 + $0xc] ss:$48 sps:$4 sm:$0xff]  }
  0x73   : > { %912 = vmatpush1.bf16.msra.mxu1 %v2913_v19  ;;  %872 = vmatprep.subr.bf16.mxu0 %v2914_v20  ;;  %v2942_v38 = vld [vmem:[#allocation5] ss:$48 sps:$4 sm:$0xff]   ;;  %v2943_v39 = vld [vmem:[#allocation5 + $0x8] ss:$48 sps:$4 sm:$0xff]   ;;  %v2946_v40 = vld [vmem:[#allocation5 + $0x2b4] ss:$48 sps:$4 sm:$0xff]  }
  0x74   : > { %913 = vmatprep.subr.bf16.mxu1 %v2916_v21  ;;  %v2949_v41 = vld [vmem:[#allocation5 + $0x2bc] ss:$48 sps:$4 sm:$0xff]   ;;  %v3299_v42 = vmov 0   ;;  %v2400_v47 = vld [vmem:[#allocation8] ss:$0 sm:$0xff]  ;;  %vm3301_vm0 = vmmov 0  }
  0x75   : > { %898 = vmatprep.mubr.bf16.mxu0 %v3299_v42  ;;  %939 = vmatprep.mubr.bf16.mxu1 %v3299_v42  ;;  %v2401_v49 = vld [vmem:[#allocation8 + $0x1] ss:$0 sm:$0xff]  ;;  %v2947_v53 = vld [vmem:[#allocation5 + $0x2b8] ss:$48 sps:$4 sm:$0xff]   ;;  %v2952_v55 = vld [vmem:[#allocation5 + $0x254] ss:$48 sps:$4 sm:$0xff]  }
  0x76   : > { %873 = vmatpush1.bf16.msra.mxu0 %v2918_v22  ;;  %v2944_v52 = vld [vmem:[#allocation5 + $0x2b0] ss:$48 sps:$4 sm:$0xff]   ;;  %v2955_v56 = vld [vmem:[#allocation5 + $0x25c] ss:$48 sps:$4 sm:$0xff]   ;;  %v2953_v58 = vld [vmem:[#allocation5 + $0x258] ss:$48 sps:$4 sm:$0xff]  }
  0x77   : > { %914 = vmatpush1.bf16.msra.mxu1 %v2919_v23  ;;  %874 = vmatprep.subr.bf16.mxu0 %v2920_v24  ;;  %v2950_v57 = vld [vmem:[#allocation5 + $0x250] ss:$48 sps:$4 sm:$0xff]   ;;  %v2958_v59 = vld [vmem:[#allocation5 + $0x1f4] ss:$48 sps:$4 sm:$0xff]   ;;  %v2961_v60 = vld [vmem:[#allocation5 + $0x1fc] ss:$48 sps:$4 sm:$0xff]  }
  0x78   : > { %915 = vmatprep.subr.bf16.mxu1 %v2922_v25  ;;  %v2956_v61 = vld [vmem:[#allocation5 + $0x1f0] ss:$48 sps:$4 sm:$0xff]   ;;  %v2959_v62 = vld [vmem:[#allocation5 + $0x1f8] ss:$48 sps:$4 sm:$0xff]   ;;  %v2964_v63 = vld [vmem:[#allocation5 + $0x194] ss:$48 sps:$4 sm:$0xff]  }
  0x79   : > { %v2967_v0 = vld [vmem:[#allocation5 + $0x19c] ss:$48 sps:$4 sm:$0xff]   ;;  %v2962_v2 = vld [vmem:[#allocation5 + $0x190] ss:$48 sps:$4 sm:$0xff]   ;;  %v2965_v3 = vld [vmem:[#allocation5 + $0x198] ss:$48 sps:$4 sm:$0xff]  }
  0x7a   : > { %875 = vmatpush1.bf16.msra.mxu0 %v2924_v26  ;;  %v2970_v4 = vld [vmem:[#allocation5 + $0x134] ss:$48 sps:$4 sm:$0xff]   ;;  %v2973_v5 = vld [vmem:[#allocation5 + $0x13c] ss:$48 sps:$4 sm:$0xff]   ;;  %v2968_v6 = vld [vmem:[#allocation5 + $0x130] ss:$48 sps:$4 sm:$0xff]  }
  0x7b   : > { %916 = vmatpush1.bf16.msra.mxu1 %v2925_v27  ;;  %876 = vmatprep.subr.bf16.mxu0 %v2926_v28  ;;  %v2971_v7 = vld [vmem:[#allocation5 + $0x138] ss:$48 sps:$4 sm:$0xff]   ;;  %v2976_v8 = vld [vmem:[#allocation5 + $0xd4] ss:$48 sps:$4 sm:$0xff]   ;;  %v2979_v9 = vld [vmem:[#allocation5 + $0xdc] ss:$48 sps:$4 sm:$0xff]  }
  0x7c   : > { %917 = vmatprep.subr.bf16.mxu1 %v2928_v29  ;;  %v2988_v16 = vld [vmem:[#allocation5 + $0x14] ss:$48 sps:$4 sm:$0xff]   ;;  %v2991_v17 = vld [vmem:[#allocation5 + $0x1c] ss:$48 sps:$4 sm:$0xff]   ;;  %v2986_v18 = vld [vmem:[#allocation5 + $0x10] ss:$48 sps:$4 sm:$0xff]  }
  0x7d   : > { %v2989_v19 = vld [vmem:[#allocation5 + $0x18] ss:$48 sps:$4 sm:$0xff]   ;;  %v2994_v20 = vld [vmem:[#allocation5 + $0x2c4] ss:$48 sps:$4 sm:$0xff]   ;;  %v2997_v21 = vld [vmem:[#allocation5 + $0x2cc] ss:$48 sps:$4 sm:$0xff]  }
  0x7e   : > { %877 = vmatpush1.bf16.msra.mxu0 %v2930_v30  ;;  %v2992_v22 = vld [vmem:[#allocation5 + $0x2c0] ss:$48 sps:$4 sm:$0xff]   ;;  %v2995_v23 = vld [vmem:[#allocation5 + $0x2c8] ss:$48 sps:$4 sm:$0xff]   ;;  %v3000_v24 = vld [vmem:[#allocation5 + $0x264] ss:$48 sps:$4 sm:$0xff]  }
  0x7f   : > { %918 = vmatpush1.bf16.msra.mxu1 %v2931_v31  ;;  %878 = vmatprep.subr.bf16.mxu0 %v2932_v32  ;;  %v3003_v25 = vld [vmem:[#allocation5 + $0x26c] ss:$48 sps:$4 sm:$0xff]   ;;  %v2998_v26 = vld [vmem:[#allocation5 + $0x260] ss:$48 sps:$4 sm:$0xff]   ;;  %v3001_v27 = vld [vmem:[#allocation5 + $0x268] ss:$48 sps:$4 sm:$0xff]  }
  0x80   : > { %919 = vmatprep.subr.bf16.mxu1 %v2934_v33  ;;  %v3006_v28 = vld [vmem:[#allocation5 + $0x204] ss:$48 sps:$4 sm:$0xff]   ;;  %v3009_v29 = vld [vmem:[#allocation5 + $0x20c] ss:$48 sps:$4 sm:$0xff]   ;;  %v3004_v30 = vld [vmem:[#allocation5 + $0x200] ss:$48 sps:$4 sm:$0xff]  }
  0x81   : > { %v3007_v31 = vld [vmem:[#allocation5 + $0x208] ss:$48 sps:$4 sm:$0xff]   ;;  %v3012_v32 = vld [vmem:[#allocation5 + $0x1a4] ss:$48 sps:$4 sm:$0xff]   ;;  %v3015_v33 = vld [vmem:[#allocation5 + $0x1ac] ss:$48 sps:$4 sm:$0xff]  }
  0x82   : > { %879 = vmatpush1.bf16.msra.mxu0 %v2936_v34  ;;  %v3010_v34 = vld [vmem:[#allocation5 + $0x1a0] ss:$48 sps:$4 sm:$0xff]   ;;  %vm1195_vm1 = vcmask 1043456   ;;  %vm1179_vm3 = vcmask 64512   ;;  %s2398_s21 = sshll.u32 %s3455_s13, 3  ;;  %s2568_s23 = sshll.u32 %s3350_s19, 7 }
  0x83   : > { %920 = vmatpush1.bf16.msra.mxu1 %v2937_v35  ;;  %880 = vmatprep.subr.bf16.mxu0 %v2938_v36  ;;  %v3013_v35 = vld [vmem:[#allocation5 + $0x1a8] ss:$48 sps:$4 sm:$0xff]   ;;  %v3018_v36 = vld [vmem:[#allocation5 + $0x144] ss:$48 sps:$4 sm:$0xff]   ;;  %s256_s12 = scalar_lea.vmem [#allocation10], %s2398_s21  ;;  %s3642_s30 = scalar_lea.hbm %s3689_s4, %s2568_s23 }
  0x84   : > { %921 = vmatprep.subr.bf16.mxu1 %v2940_v37  ;;  %v3021_v37 = vld [vmem:[#allocation5 + $0x14c] ss:$48 sps:$4 sm:$0xff]   ;;  %s2286_s14 = sshll.u32 %s256_s12, 4  ;;  %s2273_s19 = scalar_lea.sflag [#allocation4], %s3455_s13  ;;  %s3644_s14 = int_to_ptr.vmem [resolvable:$true] %s2286_s14 }
  0x85   : > { %s3215_s5 = scalar_lea.vmem %s3644_s14, 128  ;;  %p3707_p0 = scmp.ne.s32.totalorder %s3699_s7, 0 }
  0x86   : > { %881 = vmatpush1.bf16.msra.mxu0 %v2942_v38  ;;  %v3016_v38 = vld [vmem:[#allocation5 + $0x140] ss:$48 sps:$4 sm:$0xff]   ;;  %p3216_p12 = scmp.ne.s32.totalorder %s3644_s14, %s3215_s5  ;;  %s3303_s8 = smov [#allocation10]  }
  0x87   : > { %922 = vmatpush1.bf16.msra.mxu1 %v2943_v39  ;;  %948 = vmatprep.subr.bf16.mxu0 %v2946_v40  ;;  %v3019_v39 = vld [vmem:[#allocation5 + $0x148] ss:$48 sps:$4 sm:$0xff]   ;;  %v3024_v40 = vld [vmem:[#allocation5 + $0xe4] ss:$48 sps:$4 sm:$0xff]   ;;  %s3219_s9 = sshll.u32 %s3303_s8, 4  ;;  %s3220_s9 = int_to_ptr.vmem [resolvable:$false] %s3219_s9 }
  0x88   : > { %989 = vmatprep.subr.bf16.mxu1 %v2949_v41  ;;  %v3027_v41 = vld [vmem:[#allocation5 + $0xec] ss:$48 sps:$4 sm:$0xff]   ;;  %p3217_p5 = pnand %p3216_p12, %p3707_p0  ;;  %s3221_s26 = scalar_lea.vmem %s3220_s9, 256 }
  0x89   : > { %p3222_p1 = scmp.lt.s32.totalorder %s3644_s14, %s3220_s9  ;;  %p3223_p3 = scmp.lt.s32.totalorder %s3221_s26, %s3215_s5 }
  0x8a   : > { %p3218_p10 = pneg %p3217_p5 }
  0x8b   : > { %p3224_p6 = por %p3223_p3, %p3222_p1 }
  0x8d   : > { %p3225_p9 = pnand %p3224_p6, %p3218_p10 }
  0xf4   : > { %v264_v10 = vpop.xlane.xlu0 %263 }
  0xf5   : > { %v265_v11 = vmul.f32 0.03125, %v264_v10  ;;  %v2974_v10 = vld [vmem:[#allocation5 + $0xd0] ss:$48 sps:$4 sm:$0xff]  }
  0xf7   : > { %v266_v13 = vsub.f32 %v3471_v1, %v265_v11  ;;  %v2977_v11 = vld [vmem:[#allocation5 + $0xd8] ss:$48 sps:$4 sm:$0xff]  }
  0xf9   : > { %v3475_v14 = vmul.f32 %v2399_v12, %v266_v13  ;;  %v2982_v12 = vld [vmem:[#allocation5 + $0x74] ss:$48 sps:$4 sm:$0xff]   ;;  %v2985_v13 = vld [vmem:[#allocation5 + $0x7c] ss:$48 sps:$4 sm:$0xff]  }
  0xfb   : > { %v272_v15 = vmul.f32 %v3475_v14, %v3475_v14 }
  0xfd   : > { %273 = vadd.xlane.f32.xlu0 %v272_v15  ;;  %v2983_v15 = vld [vmem:[#allocation5 + $0x78] ss:$48 sps:$4 sm:$0xff]  }
 0x186   : > { %v274_v43 = vpop.xlane.xlu0 %273 }
 0x187   : > { %v275_v44 = vmul.f32 0.03125, %v274_v43  ;;  %v3025_v43 = vld [vmem:[#allocation5 + $0xe8] ss:$48 sps:$4 sm:$0xff]  }
 0x189   : > { %v276_v45 = vadd.f32 1e-05, %v275_v44  ;;  %v3030_v44 = vld [vmem:[#allocation5 + $0x84] ss:$48 sps:$4 sm:$0xff]  }
 0x18b   : > { %3088 = vrsqrt.f32 %v276_v45  ;;  %v3033_v45 = vld [vmem:[#allocation5 + $0x8c] ss:$48 sps:$4 sm:$0xff]  }
 0x198   : > { %v3089_v46 = vpop.eup %3088 }
 0x199   : > { %v278_v48 = vmul.f32 %v3089_v46, %v3475_v14  ;;  %v2980_v14 = vld [vmem:[#allocation5 + $0x70] ss:$48 sps:$4 sm:$0xff]  }
 0x19a   : > { %v3028_v46 = vld [vmem:[#allocation5 + $0x80] ss:$48 sps:$4 sm:$0xff]  }
 0x19b   : > { %v283_v50 = vmul.f32 %v2400_v47, %v278_v48  ;;  %v3031_v47 = vld [vmem:[#allocation5 + $0x88] ss:$48 sps:$4 sm:$0xff]   ;;  %v3036_v48 = vld [vmem:[#allocation5 + $0x24] ss:$48 sps:$4 sm:$0xff]  }
 0x19d   : > { %v288_v51 = vadd.f32 %v2401_v49, %v283_v50  ;;  %v3039_v49 = vld [vmem:[#allocation5 + $0x2c] ss:$48 sps:$4 sm:$0xff]   ;;  %v3034_v50 = vld [vmem:[#allocation5 + $0x20] ss:$48 sps:$4 sm:$0xff]  }
 0x19f   : > { %v3482_v54 = vpack.c.bf16 %v288_v51, %v288_v51  ;;  %v3037_v51 = vld [vmem:[#allocation5 + $0x28] ss:$48 sps:$4 sm:$0xff]  }
 0x1a1   : > { %899 = vmatmul.mubr.bf16.vlgmr.msra.gmra.mxu0 %v3482_v54  ;;  %940 = vmatmul.mubr.bf16.vlgmr.msra.gmra.mxu1 %v3482_v54 }
 0x1a2   : > { %949 = vmatpush1.bf16.msra.mxu0 %v2944_v52  ;;  %990 = vmatpush1.bf16.msra.mxu1 %v2947_v53  ;;  %v3300_v52 = vmov 0.0  }
 0x1a3   : > { %950 = vmatprep.subr.bf16.mxu0 %v2952_v55  ;;  %991 = vmatprep.subr.bf16.mxu1 %v2955_v56  ;;  %v2499_v56 = vld [vmem:[#allocation8 + $0x3] ss:$0 sm:$0xff] }
 0x1a4   : > { %980 = vmatprep.mubr.bf16.mxu0 %v3299_v42  ;;  %1021 = vmatprep.mubr.bf16.mxu1 %v3299_v42 }
 0x1a6   : > { %951 = vmatpush1.bf16.msra.mxu0 %v2950_v57  ;;  %992 = vmatpush1.bf16.msra.mxu1 %v2953_v58 }
 0x1a7   : > { %952 = vmatprep.subr.bf16.mxu0 %v2958_v59  ;;  %993 = vmatprep.subr.bf16.mxu1 %v2961_v60  ;;  %v2500_v59 = vld [vmem:[#allocation8 + $0x4] ss:$0 sm:$0xff] }
 0x1aa   : > { %953 = vmatpush1.bf16.msra.mxu0 %v2956_v61  ;;  %994 = vmatpush1.bf16.msra.mxu1 %v2959_v62  ;;  %v2498_v62 = vld [vmem:[#allocation8 + $0x2] ss:$0 sm:$0xff] }
 0x1ab   : > { %954 = vmatprep.subr.bf16.mxu0 %v2964_v63  ;;  %995 = vmatprep.subr.bf16.mxu1 %v2967_v0 }
 0x1ae   : > { %955 = vmatpush1.bf16.msra.mxu0 %v2962_v2  ;;  %996 = vmatpush1.bf16.msra.mxu1 %v2965_v3 }
 0x1af   : > { %956 = vmatprep.subr.bf16.mxu0 %v2970_v4  ;;  %997 = vmatprep.subr.bf16.mxu1 %v2973_v5 }
 0x1b2   : > { %957 = vmatpush1.bf16.msra.mxu0 %v2968_v6  ;;  %998 = vmatpush1.bf16.msra.mxu1 %v2971_v7 }
 0x1b3   : > { %958 = vmatprep.subr.bf16.mxu0 %v2976_v8  ;;  %999 = vmatprep.subr.bf16.mxu1 %v2979_v9 }
 0x1b6   : > { %959 = vmatpush1.bf16.msra.mxu0 %v2974_v10  ;;  %1000 = vmatpush1.bf16.msra.mxu1 %v2977_v11  ;;  %v2504_v10 = vld [vmem:[#allocation8 + $0x7] ss:$0 sm:$0xff] }
 0x1b7   : > { %960 = vmatprep.subr.bf16.mxu0 %v2982_v12  ;;  %1001 = vmatprep.subr.bf16.mxu1 %v2985_v13 }
 0x1ba   : > { %961 = vmatpush1.bf16.msra.mxu0 %v2980_v14  ;;  %1002 = vmatpush1.bf16.msra.mxu1 %v2983_v15 }
 0x1bb   : > { %962 = vmatprep.subr.bf16.mxu0 %v2988_v16  ;;  %1003 = vmatprep.subr.bf16.mxu1 %v2991_v17 }
 0x1be   : > { %963 = vmatpush1.bf16.msra.mxu0 %v2986_v18  ;;  %1004 = vmatpush1.bf16.msra.mxu1 %v2989_v19 }
 0x1bf   : > { %1030 = vmatprep.subr.bf16.mxu0 %v2994_v20  ;;  %1071 = vmatprep.subr.bf16.mxu1 %v2997_v21 }
 0x1c1   : > { %981 = vmatmul.mubr.bf16.vlgmr.msra.gmra.mxu0 %v3482_v54  ;;  %1022 = vmatmul.mubr.bf16.vlgmr.msra.gmra.mxu1 %v3482_v54 }
 0x1c2   : > { %1031 = vmatpush1.bf16.msra.mxu0 %v2992_v22  ;;  %1072 = vmatpush1.bf16.msra.mxu1 %v2995_v23 }
 0x1c3   : > { %1032 = vmatprep.subr.bf16.mxu0 %v3000_v24  ;;  %1073 = vmatprep.subr.bf16.mxu1 %v3003_v25 }
 0x1c4   : > { %1062 = vmatprep.mubr.bf16.mxu0 %v3299_v42  ;;  %1103 = vmatprep.mubr.bf16.mxu1 %v3299_v42  ;;  %v3022_v42 = vld [vmem:[#allocation5 + $0xe0] ss:$48 sps:$4 sm:$0xff]  }
 0x1c6   : > { %1033 = vmatpush1.bf16.msra.mxu0 %v2998_v26  ;;  %1074 = vmatpush1.bf16.msra.mxu1 %v3001_v27 }
 0x1c7   : > { %1034 = vmatprep.subr.bf16.mxu0 %v3006_v28  ;;  %1075 = vmatprep.subr.bf16.mxu1 %v3009_v29  ;;  %v1112_v28 = vlaneseq }
 0x1c9   : > { %v1113_v29 = vshrl.u32 %v1112_v28, 7 }
 0x1ca   : > { %1035 = vmatpush1.bf16.msra.mxu0 %v3004_v30  ;;  %1076 = vmatpush1.bf16.msra.mxu1 %v3007_v31  ;;  %v1115_v30 = vand.u32 127, %v1112_v28  ;;  %v3302_v31 = vmov -1e+30   ;;  %v3043_v28 = vld [vmem:[#allocation7 + $0x20] sm:$0xff]  }
 0x1cb   : > { %1036 = vmatprep.subr.bf16.mxu0 %v3012_v32  ;;  %1077 = vmatprep.subr.bf16.mxu1 %v3015_v33 }
 0x1cc   : > { %vm1116_vm2 = vcmp.ge.s32.totalorder %v1113_v29, %v1115_v30  ;;  %v3044_v29 = vld [vmem:[#allocation7 + $0x18] sm:$0xff]   ;;  %v3045_v30 = vld [vmem:[#allocation7 + $0x10] sm:$0xff]  }
 0x1cd   : > { %v3521_v32 = vsel %vm1116_vm2, 0.0, %v3302_v31  ;;  %v2524_v31 = vld [vmem:[#allocation8 + $0xa] ss:$0 sm:$0xff] }
 0x1ce   : > { %1037 = vmatpush1.bf16.msra.mxu0 %v3010_v34  ;;  %1078 = vmatpush1.bf16.msra.mxu1 %v3013_v35 }
 0x1cf   : > { %1038 = vmatprep.subr.bf16.mxu0 %v3018_v36  ;;  %1079 = vmatprep.subr.bf16.mxu1 %v3021_v37 }
 0x1d2   : > { %1039 = vmatpush1.bf16.msra.mxu0 %v3016_v38  ;;  %1080 = vmatpush1.bf16.msra.mxu1 %v3019_v39 }
 0x1d3   : > { %1040 = vmatprep.subr.bf16.mxu0 %v3024_v40  ;;  %1081 = vmatprep.subr.bf16.mxu1 %v3027_v41 }
 0x1d6   : > { %1041 = vmatpush1.bf16.msra.mxu0 %v3022_v42  ;;  %1082 = vmatpush1.bf16.msra.mxu1 %v3025_v43 }
 0x1d7   : > { %1042 = vmatprep.subr.bf16.mxu0 %v3030_v44  ;;  %1083 = vmatprep.subr.bf16.mxu1 %v3033_v45  ;;  %v2503_v45 = vld [vmem:[#allocation8 + $0x6] ss:$0 sm:$0xff] }
 0x1da   : > { %1043 = vmatpush1.bf16.msra.mxu0 %v3028_v46  ;;  %1084 = vmatpush1.bf16.msra.mxu1 %v3031_v47 }
 0x1db   : > { %1044 = vmatprep.subr.bf16.mxu0 %v3036_v48  ;;  %1085 = vmatprep.subr.bf16.mxu1 %v3039_v49 }
 0x1de   : > { %1045 = vmatpush1.bf16.msra.mxu0 %v3034_v50  ;;  %1086 = vmatpush1.bf16.msra.mxu1 %v3037_v51  ;;  %v2502_v50 = vld [vmem:[#allocation8 + $0x5] ss:$0 sm:$0xff] }
 0x1df   : > { %2641 = vmatprep.subr.bf16.mxu0 %v3300_v52  ;;  %2659 = vmatprep.subr.bf16.mxu1 %v3300_v52 }
 0x1e1   : > { %1063 = vmatmul.mubr.bf16.vlgmr.msra.gmra.mxu0 %v3482_v54  ;;  %1104 = vmatmul.mubr.bf16.vlgmr.msra.gmra.mxu1 %v3482_v54 }
 0x1e2   : > { %2643 = vmatprep.mubr.msk.bf16.mxu0 %vm3301_vm0, %v3300_v52  ;;  %2661 = vmatprep.mubr.msk.bf16.mxu1 %vm3301_vm0, %v3300_v52 }
 0x261   : > { %v900_v53 = vpop.f32.mrf.mxu0  ;;  %v941_v55 = vpop.f32.mrf.mxu1 }
 0x262   : > { %v1137_v0 = vadd.f32 %v2500_v59, %v941_v55  ;;  %v1123_v4 = vadd.f32 %v2498_v62, %v900_v53 }
 0x263   : > { %v902_v57 = vpop.f32.mrf.mxu0  ;;  %v3500_v58 = vpop.f32.mrf.mxu1 }
 0x264   : > { %v1130_v54 = vadd.f32 %v2499_v56, %v902_v57  ;;  %v1138_v5 = vpack.c.bf16 %v1137_v0, %v1137_v0  ;;  %v1124_v6 = vpack.c.bf16 %v1123_v4, %v1123_v4  ;;  %v1261_v53 = vadd.f32 %v2502_v50, %v3500_v58 }
 0x265   : > { %v904_v60 = vpop.f32.mrf.mxu0  ;;  %v945_v61 = vpop.f32.mrf.mxu1 }
 0x266   : > { %v1131_v63 = vpack.c.bf16 %v1130_v54, %v1130_v54  ;;  %v1197_v7 = vsel %vm1195_vm1, %v1138_v5, 0  ;;  %v1262_v55 = vpack.c.bf16 %v1261_v53, %v1261_v53 }
 0x267   : > { %v905_v2 = vpop.f32.mrf.mxu0  ;;  %v946_v3 = vpop.f32.mrf.mxu1 }
 0x268   : > { %2642 = vmatpush3.bf16.xpose.msra.mxu0 %v1131_v63 }
 0x269   : > { %2647 = vmatprep.subr.bf16.mxu0 %v3300_v52 }
 0x26f   : > { %2644 = vmatmul.mubr.bf16.vlgmr.msra.gmra.mxu0 %v1124_v6 }
 0x270   : > { %2648 = vmatpush3.bf16.msra.mxu0 %v1197_v7  ;;  %2649 = vmatprep.mubr.msk.bf16.mxu0 %vm3301_vm0, %v3300_v52  ;;  %v3048_v7 = vld [vmem:[#allocation7 + $0x78] sm:$0xff]  }
 0x271   : > { %2653 = vmatprep.subr.bf16.mxu0 %v3300_v52 }
 0x281   : > { %v982_v8 = vpop.f32.mrf.mxu0  ;;  %v3507_v9 = vpop.f32.mrf.mxu1 }
 0x282   : > { %v1268_v47 = vadd.f32 %v2503_v45, %v982_v8  ;;  %v3049_v8 = vld [vmem:[#allocation7 + $0x70] sm:$0xff]  }
 0x283   : > { %v984_v11 = vpop.f32.mrf.mxu0  ;;  %v3509_v12 = vpop.f32.mrf.mxu1 }
 0x284   : > { %v1275_v13 = vadd.f32 %v2504_v10, %v984_v11  ;;  %v1269_v51 = vpack.c.bf16 %v1268_v47, %v1268_v47  ;;  %v3050_v10 = vld [vmem:[#allocation7 + $0x68] sm:$0xff]   ;;  %v3051_v11 = vld [vmem:[#allocation7 + $0x60] sm:$0xff]  }
 0x285   : > { %v986_v14 = vpop.f32.mrf.mxu0  ;;  %v1027_v15 = vpop.f32.mrf.mxu1 }
 0x286   : > { %v1276_v16 = vpack.c.bf16 %v1275_v13, %v1275_v13  ;;  %v3052_v13 = vld [vmem:[#allocation7 + $0x58] sm:$0xff]   ;;  %v3053_v14 = vld [vmem:[#allocation7 + $0x50] sm:$0xff]   ;;  %v3054_v15 = vld [vmem:[#allocation7 + $0x48] sm:$0xff]  }
 0x287   : > { %v987_v17 = vpop.f32.mrf.mxu0  ;;  %v1028_v18 = vpop.f32.mrf.mxu1 }
 0x288   : > { %v1333_v19 = vsel %vm1195_vm1, %v1276_v16, 0  ;;  %v3055_v16 = vld [vmem:[#allocation7 + $0x40] sm:$0xff]  }
 0x289   : > { %2660 = vmatpush3.bf16.msra.mxu1 %v1333_v19 }
 0x28a   : > { %2685 = vmatprep.subr.bf16.mxu1 %v3300_v52 }
 0x2a1   : > { %v3513_v20 = vpop.f32.mrf.mxu0  ;;  %v3515_v21 = vpop.f32.mrf.mxu1 }
 0x2a3   : > { %v3517_v22 = vpop.f32.mrf.mxu0  ;;  %v3519_v23 = vpop.f32.mrf.mxu1 }
 0x2a5   : > { %v1068_v24 = vpop.f32.mrf.mxu0  ;;  %v1109_v25 = vpop.f32.mrf.mxu1 }
 0x2a6   : > { %v3040_v24 = vld [vmem:[#allocation7 + $0x38] sm:$0xff]  }
 0x2a7   : > { %v1069_v26 = vpop.f32.mrf.mxu0  ;;  %v1110_v27 = vpop.f32.mrf.mxu1 }
 0x2a8   : > { %v3041_v26 = vld [vmem:[#allocation7 + $0x30] sm:$0xff]   ;;  %v3042_v27 = vld [vmem:[#allocation7 + $0x28] sm:$0xff]  }
 0x32f   : > { %v1173_v33 = vpop.f32.mrf.mxu0 }
 0x330   : > { %v1174_v34 = vadd.f32 %v1173_v33, %v3521_v32  ;;  %v3046_v33 = vld [vmem:[#allocation7 + $0x8] sm:$0xff]  }
 0x331   : > { %v2645_v35 = vpop.f32.mrf.mxu0 }
 0x332   : > { %v1180_v36 = vsel %vm1179_vm3, %v1174_v34, -inf  ;;  %v3047_v35 = vld [vmem:[#allocation7] sm:$0xff]  }
 0x333   : > { %1181 = vmax.xlane.f32.xlu1 %v1180_v36  ;;  %v1176_v37 = vpop.f32.mrf.mxu0 }
 0x335   : > { %v2646_v38 = vpop.f32.mrf.mxu0 }
 0x3bc   : > { %v1182_v39 = vpop.xlane.xlu1 %1181 }
 0x3bd   : > { %v1183_v40 = vsub.f32 %v1174_v34, %v1182_v39  ;;  %v1587_v34 = vadd.f32 %v2524_v31, %v3513_v20  ;;  %v2523_v20 = vld [vmem:[#allocation8 + $0x9] ss:$0 sm:$0xff] }
 0x3be   : > { %v1580_v39 = vadd.f32 %v2523_v20, %v3509_v12 }
 0x3bf   : > { %v1184_v41 = vmul.f32 1.442695, %v1183_v40  ;;  %v1588_v36 = vpack.c.bf16 %v1587_v34, %v1587_v34 }
 0x3c1   : > { %3090 = vpow2.f32 %v1184_v41  ;;  %v1645_v38 = vsel %vm1195_vm1, %v1588_v36, 0 }
 0x3ce   : > { %v3091_v42 = vpop.eup %3090 }
 0x3cf   : > { %v1186_v43 = vsel %vm1179_vm3, %v3091_v42, 0.0 }
 0x3d0   : > { %1187 = vadd.xlane.f32.xlu1 %v1186_v43  ;;  %v1581_v43 = vpack.c.bf16 %v1580_v39, %v1580_v39 }
 0x459   : > { %v1188_v44 = vpop.xlane.xlu1 %1187 }
 0x45a   : > { %3092 = vrcp.f32 %v1188_v44 }
 0x467   : > { %v3093_v46 = vpop.eup %3092 }
 0x468   : > { %v1190_v48 = vmul.f32 %v3093_v46, %v3091_v42  ;;  %v2522_v42 = vld [vmem:[#allocation8 + $0x8] ss:$0 sm:$0xff] }
 0x469   : > { %v1573_v46 = vadd.f32 %v2522_v42, %v3507_v9 }
 0x46a   : > { %v1191_v49 = vpack.c.bf16 %v1190_v48, %v1190_v48 }
 0x46b   : > { %v1574_v48 = vpack.c.bf16 %v1573_v46, %v1573_v46 }
 0x46c   : > { %2650 = vmatmul.mubr.msk.bf16.vlgmr.msra.gmra.mxu0 %vm1179_vm3, %v1191_v49 }
 0x46d   : > { %2654 = vmatpush3.bf16.xpose.msra.mxu0 %v1269_v51  ;;  %2655 = vmatprep.mubr.msk.bf16.mxu0 %vm3301_vm0, %v3300_v52 }
 0x46e   : > { %2665 = vmatprep.subr.bf16.mxu0 %v3300_v52 }
 0x474   : > { %2656 = vmatmul.mubr.bf16.vlgmr.msra.gmra.mxu0 %v1262_v55 }
 0x475   : > { %2681 = vmatprep.mubr.msk.bf16.mxu0 %vm3301_vm0, %v3300_v52  ;;  %2666 = vmatpush3.bf16.msra.mxu0 %v3048_v7  ;;  %v3059_v7 = vld [vmem:[#allocation7 + $0xa0] sm:$0xff]  }
 0x476   : > { %2667 = vmatprep.subr.bf16.mxu0 %v3300_v52 }
 0x479   : > { %2668 = vmatpush3.bf16.msra.mxu0 %v3049_v8  ;;  %v3060_v8 = vld [vmem:[#allocation7 + $0x98] sm:$0xff]  }
 0x47a   : > { %2669 = vmatprep.subr.bf16.mxu0 %v3300_v52 }
 0x47d   : > { %2670 = vmatpush3.bf16.msra.mxu0 %v3050_v10  ;;  %v3061_v10 = vld [vmem:[#allocation7 + $0x90] sm:$0xff]  }
 0x47e   : > { %2671 = vmatprep.subr.bf16.mxu0 %v3300_v52 }
 0x481   : > { %2672 = vmatpush3.bf16.msra.mxu0 %v3051_v11  ;;  %v3062_v11 = vld [vmem:[#allocation7 + $0x88] sm:$0xff]  }
 0x482   : > { %2673 = vmatprep.subr.bf16.mxu0 %v3300_v52 }
 0x485   : > { %2674 = vmatpush3.bf16.msra.mxu0 %v3052_v13 }
 0x486   : > { %2675 = vmatprep.subr.bf16.mxu0 %v3300_v52 }
 0x489   : > { %2676 = vmatpush3.bf16.msra.mxu0 %v3053_v14  ;;  %v2535_v14 = vld [vmem:[#allocation8 + $0xc] ss:$0 sm:$0xff] }
 0x48a   : > { %2677 = vmatprep.subr.bf16.mxu0 %v3300_v52 }
 0x48d   : > { %2678 = vmatpush3.bf16.msra.mxu0 %v3054_v15 }
 0x48e   : > { %2679 = vmatprep.subr.bf16.mxu0 %v3300_v52 }
 0x491   : > { %2680 = vmatpush3.bf16.msra.mxu0 %v3055_v16  ;;  %v1805_v16 = vadd.f32 %v2535_v14, %v3515_v21  ;;  %v3073_v14 = vld [vmem:[#allocation7 + $0x130] sm:$0xff]  }
 0x492   : > { %2705 = vmatprep.subr.bf16.mxu0 %v3300_v52 }
 0x52c   : > { %v3533_v56 = vpop.f32.mrf.mxu0 }
 0x52d   : > { %v1239_v37 = vpack.c.bf16 %v3533_v56, %v3533_v56 }
 0x52e   : > { %v2651_v57 = vpop.f32.mrf.mxu0 }
 0x530   : > { %v1236_v59 = vpop.f32.mrf.mxu0 }
 0x532   : > { %v2652_v54 = vpop.f32.mrf.mxu0 }
 0x534   : > { %v1311_v60 = vpop.f32.mrf.mxu0 }
 0x535   : > { %v1312_v61 = vadd.f32 %v1311_v60, %v3521_v32 }
 0x536   : > { %v2657_v62 = vpop.f32.mrf.mxu0 }
 0x537   : > { %v1317_v63 = vsel %vm1179_vm3, %v1312_v61, -inf }
 0x538   : > { %1318 = vmax.xlane.f32.xlu0 %v1317_v63  ;;  %v1314_v58 = vpop.f32.mrf.mxu0 }
 0x53a   : > { %v2658_v0 = vpop.f32.mrf.mxu0 }
 0x5c1   : > { %v1319_v2 = vpop.xlane.xlu0 %1318 }
 0x5c2   : > { %v1320_v3 = vsub.f32 %v1312_v61, %v1319_v2 }
 0x5c4   : > { %v1321_v4 = vmul.f32 1.442695, %v1320_v3 }
 0x5c6   : > { %3094 = vpow2.f32 %v1321_v4  ;;  %v3056_v4 = vld [vmem:[#allocation7 + $0xb8] sm:$0xff]  }
 0x5d3   : > { %v3095_v5 = vpop.eup %3094 }
 0x5d4   : > { %v1323_v6 = vsel %vm1179_vm3, %v3095_v5, 0.0 }
 0x5d5   : > { %1324 = vadd.xlane.f32.xlu1 %v1323_v6  ;;  %v3058_v6 = vld [vmem:[#allocation7 + $0xa8] sm:$0xff]  }
 0x65e   : > { %v1325_v17 = vpop.xlane.xlu1 %1324 }
 0x65f   : > { %3096 = vrcp.f32 %v1325_v17 }
 0x66c   : > { %v3097_v18 = vpop.eup %3096 }
 0x66d   : > { %v1327_v19 = vmul.f32 %v3097_v18, %v3095_v5  ;;  %v3057_v5 = vld [vmem:[#allocation7 + $0xb0] sm:$0xff]   ;;  %v2536_v18 = vld [vmem:[#allocation8 + $0xd] ss:$0 sm:$0xff] }
 0x66f   : > { %v1328_v25 = vpack.c.bf16 %v1327_v19, %v1327_v19 }
 0x671   : > { %2662 = vmatmul.mubr.msk.bf16.vlgmr.msra.gmra.mxu1 %vm1179_vm3, %v1328_v25  ;;  %v2534_v25 = vld [vmem:[#allocation8 + $0xb] ss:$0 sm:$0xff] }
 0x672   : > { %2686 = vmatpush3.bf16.msra.mxu1 %v3040_v24  ;;  %2701 = vmatprep.mubr.msk.bf16.mxu1 %vm3301_vm0, %v3300_v52  ;;  %v1806_v24 = vpack.c.bf16 %v1805_v16, %v1805_v16 }
 0x673   : > { %2687 = vmatprep.subr.bf16.mxu1 %v3300_v52 }
 0x676   : > { %2688 = vmatpush3.bf16.msra.mxu1 %v3041_v26  ;;  %v1812_v26 = vadd.f32 %v2536_v18, %v3519_v23  ;;  %v3063_v23 = vld [vmem:[#allocation7 + $0x80] sm:$0xff]   ;;  %v3108_v18 = vld [vmem:[#allocation8 + $0x13] ss:$0 sm:$0xff] }
 0x677   : > { %2689 = vmatprep.subr.bf16.mxu1 %v3300_v52 }
 0x67a   : > { %2690 = vmatpush3.bf16.msra.mxu1 %v3042_v27  ;;  %v1798_v27 = vadd.f32 %v2534_v25, %v3517_v22  ;;  %v3075_v25 = vld [vmem:[#allocation7 + $0x120] sm:$0xff]  }
 0x67b   : > { %2691 = vmatprep.subr.bf16.mxu1 %v3300_v52 }
 0x67e   : > { %2692 = vmatpush3.bf16.msra.mxu1 %v3043_v28  ;;  %v1813_v28 = vpack.c.bf16 %v1812_v26, %v1812_v26  ;;  %v3076_v26 = vld [vmem:[#allocation7 + $0x118] sm:$0xff]  }
 0x67f   : > { %2693 = vmatprep.subr.bf16.mxu1 %v3300_v52 }
 0x680   : > { %v1870_v21 = vsel %vm1195_vm1, %v1813_v28, 0  ;;  %v3078_v28 = vld [vmem:[#allocation7 + $0x108] sm:$0xff]  }
 0x682   : > { %2694 = vmatpush3.bf16.msra.mxu1 %v3044_v29  ;;  %v1799_v29 = vpack.c.bf16 %v1798_v27, %v1798_v27  ;;  %v3077_v27 = vld [vmem:[#allocation7 + $0x110] sm:$0xff]  }
 0x683   : > { %2695 = vmatprep.subr.bf16.mxu1 %v3300_v52 }
 0x686   : > { %2696 = vmatpush3.bf16.msra.mxu1 %v3045_v30 }
 0x687   : > { %2697 = vmatprep.subr.bf16.mxu1 %v3300_v52 }
 0x68a   : > { %2698 = vmatpush3.bf16.msra.mxu1 %v3046_v33 }
 0x68b   : > { %2699 = vmatprep.subr.bf16.mxu1 %v3300_v52 }
 0x68e   : > { %2700 = vmatpush3.bf16.msra.mxu1 %v3047_v35 }
 0x68f   : > { %2711 = vmatprep.subr.bf16.mxu1 %v3300_v52 }
 0x691   : > { %2702 = vmatmul.mubr.bf16.vlgmr.msra.gmra.mxu1 %v1239_v37 }
 0x692   : > { %2712 = vmatpush3.bf16.msra.mxu1 %v1645_v38  ;;  %2713 = vmatprep.mubr.msk.bf16.mxu1 %vm3301_vm0, %v3300_v52 }
 0x693   : > { %2737 = vmatprep.subr.bf16.mxu1 %v3300_v52 }
 0x731   : > { %v1369_v40 = vpop.f32.mrf.mxu1 }
 0x732   : > { %v1375_v41 = vpack.c.bf16 %v1369_v40, %v1369_v40 }
 0x733   : > { %v2663_v44 = vpop.f32.mrf.mxu1 }
 0x734   : > { %2682 = vmatmul.mubr.bf16.vlgmr.msra.gmra.mxu0 %v1375_v41 }
 0x735   : > { %2706 = vmatpush3.bf16.xpose.msra.mxu0 %v1581_v43  ;;  %v1372_v45 = vpop.f32.mrf.mxu1  ;;  %2707 = vmatprep.mubr.msk.bf16.mxu0 %vm3301_vm0, %v3300_v52 }
 0x736   : > { %2717 = vmatprep.subr.bf16.mxu0 %v3300_v52 }
 0x737   : > { %v2664_v47 = vpop.f32.mrf.mxu1 }
 0x73c   : > { %2708 = vmatmul.mubr.bf16.vlgmr.msra.gmra.mxu0 %v1574_v48 }
 0x73d   : > { %2733 = vmatprep.mubr.msk.bf16.mxu0 %vm3301_vm0, %v3300_v52  ;;  %2718 = vmatpush3.bf16.msra.mxu0 %v3056_v4 }
 0x73e   : > { %2719 = vmatprep.subr.bf16.mxu0 %v3300_v52 }
 0x741   : > { %2720 = vmatpush3.bf16.msra.mxu0 %v3057_v5 }
 0x742   : > { %2721 = vmatprep.subr.bf16.mxu0 %v3300_v52 }
 0x745   : > { %2722 = vmatpush3.bf16.msra.mxu0 %v3058_v6  ;;  %v2546_v6 = vld [vmem:[#allocation8 + $0xe] ss:$0 sm:$0xff] }
 0x746   : > { %2723 = vmatprep.subr.bf16.mxu0 %v3300_v52 }
 0x749   : > { %2724 = vmatpush3.bf16.msra.mxu0 %v3059_v7 }
 0x74a   : > { %2725 = vmatprep.subr.bf16.mxu0 %v3300_v52 }
 0x74d   : > { %2726 = vmatpush3.bf16.msra.mxu0 %v3060_v8 }
 0x74e   : > { %2727 = vmatprep.subr.bf16.mxu0 %v3300_v52 }
 0x751   : > { %v3571_v12 = vpop.f32.mrf.mxu1  ;;  %2728 = vmatpush3.bf16.msra.mxu0 %v3061_v10 }
 0x752   : > { %2729 = vmatprep.subr.bf16.mxu0 %v3300_v52 }
 0x753   : > { %v2703_v49 = vpop.f32.mrf.mxu1 }
 0x755   : > { %v1565_v50 = vpop.f32.mrf.mxu1  ;;  %2730 = vmatpush3.bf16.msra.mxu0 %v3062_v11 }
 0x756   : > { %2731 = vmatprep.subr.bf16.mxu0 %v3300_v52 }
 0x757   : > { %v2704_v51 = vpop.f32.mrf.mxu1 }
 0x759   : > { %2732 = vmatpush3.bf16.msra.mxu0 %v3063_v23  ;;  %v3081_v23 = vld [vmem:[#allocation7 + $0x170] sm:$0xff]  }
 0x75a   : > { %2769 = vmatprep.subr.bf16.mxu0 %v3300_v52 }
 0x7f4   : > { %v3573_v53 = vpop.f32.mrf.mxu0 }
 0x7f5   : > { %v1563_v45 = vadd.f32 %v3571_v12, %v3573_v53  ;;  %v3066_v12 = vld [vmem:[#allocation7 + $0xe8] sm:$0xff]   ;;  %v3067_v53 = vld [vmem:[#allocation7 + $0xe0] sm:$0xff]  }
 0x7f6   : > { %v2683_v55 = vpop.f32.mrf.mxu0 }
 0x7f8   : > { %v1477_v56 = vpop.f32.mrf.mxu0 }
 0x7f9   : > { %v3064_v56 = vld [vmem:[#allocation7 + $0xf8] sm:$0xff]  }
 0x7fa   : > { %v2684_v57 = vpop.f32.mrf.mxu0 }
 0x7fc   : > { %v1623_v59 = vpop.f32.mrf.mxu0 }
 0x7fd   : > { %v1624_v9 = vadd.f32 %v1623_v59, %v3521_v32  ;;  %v3065_v59 = vld [vmem:[#allocation7 + $0xf0] sm:$0xff]  }
 0x7fe   : > { %v2709_v54 = vpop.f32.mrf.mxu0 }
 0x7ff   : > { %v1629_v60 = vsel %vm1179_vm3, %v1624_v9, -inf  ;;  %v3069_v54 = vld [vmem:[#allocation7 + $0xd0] sm:$0xff]  }
 0x800   : > { %1630 = vmax.xlane.f32.xlu0 %v1629_v60  ;;  %v1626_v61 = vpop.f32.mrf.mxu0  ;;  %v3070_v60 = vld [vmem:[#allocation7 + $0xc8] sm:$0xff]  }
 0x801   : > { %v3071_v61 = vld [vmem:[#allocation7 + $0xc0] sm:$0xff]  }
 0x802   : > { %v2710_v62 = vpop.f32.mrf.mxu0 }
 0x889   : > { %v1631_v63 = vpop.xlane.xlu0 %1630 }
 0x88a   : > { %v1632_v58 = vsub.f32 %v1624_v9, %v1631_v63  ;;  %v3068_v9 = vld [vmem:[#allocation7 + $0xd8] sm:$0xff]  }
 0x88c   : > { %v1633_v0 = vmul.f32 1.442695, %v1632_v58 }
 0x88e   : > { %3098 = vpow2.f32 %v1633_v0 }
 0x89b   : > { %v3099_v2 = vpop.eup %3098 }
 0x89c   : > { %v1635_v3 = vsel %vm1179_vm3, %v3099_v2, 0.0 }
 0x89d   : > { %1636 = vadd.xlane.f32.xlu1 %v1635_v3 }
 0x926   : > { %v1637_v13 = vpop.xlane.xlu1 %1636 }
 0x927   : > { %3100 = vrcp.f32 %v1637_v13  ;;  %v3072_v13 = vld [vmem:[#allocation7 + $0x138] sm:$0xff]  }
 0x934   : > { %v3101_v15 = vpop.eup %3100 }
 0x935   : > { %v1639_v17 = vmul.f32 %v3101_v15, %v3099_v2 }
 0x937   : > { %v1640_v19 = vpack.c.bf16 %v1639_v17, %v1639_v17 }
 0x939   : > { %2714 = vmatmul.mubr.msk.bf16.vlgmr.msra.gmra.mxu1 %vm1179_vm3, %v1640_v19 }
 0x93a   : > { %2738 = vmatpush3.bf16.xpose.msra.mxu1 %v1806_v24  ;;  %2739 = vmatprep.mubr.msk.bf16.mxu1 %vm3301_vm0, %v3300_v52  ;;  %v3074_v24 = vld [vmem:[#allocation7 + $0x128] sm:$0xff]  }
 0x93b   : > { %2743 = vmatprep.subr.bf16.mxu1 %v3300_v52 }
 0x941   : > { %2740 = vmatmul.mubr.bf16.vlgmr.msra.gmra.mxu1 %v1799_v29  ;;  %v3079_v29 = vld [vmem:[#allocation7 + $0x100] sm:$0xff]  }
 0x942   : > { %2744 = vmatpush3.bf16.msra.mxu1 %v1870_v21  ;;  %2745 = vmatprep.mubr.msk.bf16.mxu1 %vm3301_vm0, %v3300_v52  ;;  %v3080_v21 = vld [vmem:[#allocation7 + $0x178] sm:$0xff]  }
 0x943   : > { %2749 = vmatprep.subr.bf16.mxu1 %v3300_v52 }
 0x9f9   : > { %v1681_v30 = vpop.f32.mrf.mxu1 }
 0x9fa   : > { %v1687_v31 = vpack.c.bf16 %v1681_v30, %v1681_v30  ;;  %v3082_v30 = vld [vmem:[#allocation7 + $0x168] sm:$0xff]  }
 0x9fb   : > { %v2715_v22 = vpop.f32.mrf.mxu1 }
 0x9fc   : > { %2734 = vmatmul.mubr.bf16.vlgmr.msra.gmra.mxu0 %v1687_v31  ;;  %v3083_v31 = vld [vmem:[#allocation7 + $0x160] sm:$0xff]   ;;  %v3084_v22 = vld [vmem:[#allocation7 + $0x158] sm:$0xff]  }
 0x9fd   : > { %v1684_v33 = vpop.f32.mrf.mxu1  ;;  %2785 = vmatprep.mubr.msk.bf16.mxu0 %vm3301_vm0, %v3300_v52  ;;  %2770 = vmatpush3.bf16.msra.mxu0 %v3072_v13 }
 0x9fe   : > { %2771 = vmatprep.subr.bf16.mxu0 %v3300_v52  ;;  %v3085_v33 = vld [vmem:[#allocation7 + $0x150] sm:$0xff]  }
 0x9ff   : > { %v2716_v34 = vpop.f32.mrf.mxu1 }
 0xa01   : > { %v1848_v35 = vpop.f32.mrf.mxu1  ;;  %2772 = vmatpush3.bf16.msra.mxu0 %v3073_v14 }
 0xa02   : > { %v1849_v36 = vadd.f32 %v1848_v35, %v3521_v32  ;;  %2773 = vmatprep.subr.bf16.mxu0 %v3300_v52 }
 0xa03   : > { %v2741_v37 = vpop.f32.mrf.mxu1 }
 0xa04   : > { %v1854_v38 = vsel %vm1179_vm3, %v1849_v36, -inf }
 0xa05   : > { %1855 = vmax.xlane.f32.xlu0 %v1854_v38  ;;  %v1851_v20 = vpop.f32.mrf.mxu1  ;;  %2774 = vmatpush3.bf16.msra.mxu0 %v3074_v24  ;;  %v2547_v38 = vld [vmem:[#allocation8 + $0xf] ss:$0 sm:$0xff] }
 0xa06   : > { %2775 = vmatprep.subr.bf16.mxu0 %v3300_v52 }
 0xa07   : > { %v2742_v39 = vpop.f32.mrf.mxu1 }
 0xa08   : > { %v2548_v39 = vld [vmem:[#allocation8 + $0x10] ss:$0 sm:$0xff] }
 0xa09   : > { %2776 = vmatpush3.bf16.msra.mxu0 %v3075_v25 }
 0xa0a   : > { %2777 = vmatprep.subr.bf16.mxu0 %v3300_v52 }
 0xa0d   : > { %2778 = vmatpush3.bf16.msra.mxu0 %v3076_v26 }
 0xa0e   : > { %2779 = vmatprep.subr.bf16.mxu0 %v3300_v52 }
 0xa11   : > { %2780 = vmatpush3.bf16.msra.mxu0 %v3077_v27 }
 0xa12   : > { %2781 = vmatprep.subr.bf16.mxu0 %v3300_v52 }
 0xa15   : > { %2782 = vmatpush3.bf16.msra.mxu0 %v3078_v28 }
 0xa16   : > { %2783 = vmatprep.subr.bf16.mxu0 %v3300_v52 }
 0xa19   : > { %2784 = vmatpush3.bf16.msra.mxu0 %v3079_v29 }
 0xa8e   : > { %v1856_v40 = vpop.xlane.xlu0 %1855 }
 0xa8f   : > { %v1857_v41 = vsub.f32 %v1849_v36, %v1856_v40 }
 0xa91   : > { %v1858_v42 = vmul.f32 1.442695, %v1857_v41 }
 0xa93   : > { %3102 = vpow2.f32 %v1858_v42 }
 0xaa0   : > { %v3103_v43 = vpop.eup %3102 }
 0xaa1   : > { %v1860_v44 = vsel %vm1179_vm3, %v3103_v43, 0.0 }
 0xaa2   : > { %1861 = vadd.xlane.f32.xlu1 %v1860_v44  ;;  %v3087_v44 = vld [vmem:[#allocation7 + $0x140] sm:$0xff]  }
 0xabc   : > { %v1786_v46 = vpop.f32.mrf.mxu0 }
 0xabd   : > { %v1792_v47 = vadd.f32 %v1786_v46, %v1563_v45  ;;  %v2549_v45 = vld [vmem:[#allocation8 + $0x11] ss:$0 sm:$0xff] }
 0xabe   : > { %v2735_v32 = vpop.f32.mrf.mxu0 }
 0xac0   : > { %v1789_v48 = vpop.f32.mrf.mxu0 }
 0xac2   : > { %v2736_v49 = vpop.f32.mrf.mxu0 }
 0xb2b   : > { %v1862_v50 = vpop.xlane.xlu1 %1861 }
 0xb2c   : > { %3104 = vrcp.f32 %v1862_v50 }
 0xb39   : > { %v3105_v51 = vpop.eup %3104 }
 0xb3a   : > { %v1864_v55 = vmul.f32 %v3105_v51, %v3103_v43  ;;  %v3086_v43 = vld [vmem:[#allocation7 + $0x148] sm:$0xff]  }
 0xb3c   : > { %v1865_v57 = vpack.c.bf16 %v1864_v55, %v1864_v55  ;;  %v2558_v55 = vld [vmem:[#allocation8 + $0x12] ss:$0 sm:$0xff] }
 0xb3e   : > { %2746 = vmatmul.mubr.msk.bf16.vlgmr.msra.gmra.mxu1 %vm1179_vm3, %v1865_v57 }
 0xb3f   : > { %2750 = vmatpush3.bf16.msra.mxu1 %v3064_v56  ;;  %2765 = vmatprep.mubr.msk.bf16.mxu1 %vm3301_vm0, %v3300_v52 }
 0xb40   : > { %2751 = vmatprep.subr.bf16.mxu1 %v3300_v52 }
 0xb43   : > { %2752 = vmatpush3.bf16.msra.mxu1 %v3065_v59 }
 0xb44   : > { %2753 = vmatprep.subr.bf16.mxu1 %v3300_v52 }
 0xb47   : > { %2754 = vmatpush3.bf16.msra.mxu1 %v3066_v12 }
 0xb48   : > { %2755 = vmatprep.subr.bf16.mxu1 %v3300_v52 }
 0xb4b   : > { %2756 = vmatpush3.bf16.msra.mxu1 %v3067_v53 }
 0xb4c   : > { %2757 = vmatprep.subr.bf16.mxu1 %v3300_v52 }
 0xb4f   : > { %2758 = vmatpush3.bf16.msra.mxu1 %v3068_v9 }
 0xb50   : > { %2759 = vmatprep.subr.bf16.mxu1 %v3300_v52 }
 0xb53   : > { %2760 = vmatpush3.bf16.msra.mxu1 %v3069_v54 }
 0xb54   : > { %2761 = vmatprep.subr.bf16.mxu1 %v3300_v52 }
 0xb57   : > { %2762 = vmatpush3.bf16.msra.mxu1 %v3070_v60 }
 0xb58   : > { %2763 = vmatprep.subr.bf16.mxu1 %v3300_v52 }
 0xb5b   : > { %2764 = vmatpush3.bf16.msra.mxu1 %v3071_v61 }
 0xb5c   : > { %2789 = vmatprep.subr.bf16.mxu1 %v3300_v52 }
 0xbfe   : > { %v1906_v62 = vpop.f32.mrf.mxu1 }
 0xbff   : > { %v1912_v63 = vpack.c.bf16 %v1906_v62, %v1906_v62 }
 0xc00   : > { %v2747_v58 = vpop.f32.mrf.mxu1 }
 0xc01   : > { %2766 = vmatmul.mubr.bf16.vlgmr.msra.gmra.mxu1 %v1912_v63 }
 0xc02   : > { %v1909_v0 = vpop.f32.mrf.mxu1  ;;  %2805 = vmatprep.mubr.msk.bf16.mxu1 %vm3301_vm0, %v3300_v52  ;;  %2790 = vmatpush3.bf16.msra.mxu1 %v3080_v21 }
 0xc03   : > { %2791 = vmatprep.subr.bf16.mxu1 %v3300_v52 }
 0xc04   : > { %v2748_v2 = vpop.f32.mrf.mxu1 }
 0xc06   : > { %2792 = vmatpush3.bf16.msra.mxu1 %v3081_v23 }
 0xc07   : > { %2793 = vmatprep.subr.bf16.mxu1 %v3300_v52 }
 0xc0a   : > { %2794 = vmatpush3.bf16.msra.mxu1 %v3082_v30 }
 0xc0b   : > { %2795 = vmatprep.subr.bf16.mxu1 %v3300_v52 }
 0xc0e   : > { %2796 = vmatpush3.bf16.msra.mxu1 %v3083_v31 }
 0xc0f   : > { %2797 = vmatprep.subr.bf16.mxu1 %v3300_v52 }
 0xc12   : > { %2798 = vmatpush3.bf16.msra.mxu1 %v3084_v22 }
 0xc13   : > { %2799 = vmatprep.subr.bf16.mxu1 %v3300_v52 }
 0xc16   : > { %2800 = vmatpush3.bf16.msra.mxu1 %v3085_v33 }
 0xc17   : > { %2801 = vmatprep.subr.bf16.mxu1 %v3300_v52 }
 0xc1a   : > { %2802 = vmatpush3.bf16.msra.mxu1 %v3086_v43 }
 0xc1b   : > { %2803 = vmatprep.subr.bf16.mxu1 %v3300_v52 }
 0xc1e   : > { %2804 = vmatpush3.bf16.msra.mxu1 %v3087_v44 }
 0xcc1   : > { %v2011_v3 = vpop.f32.mrf.mxu1 }
 0xcc2   : > { %v2017_v4 = vadd.f32 %v2011_v3, %v1792_v47 }
 0xcc3   : > { %v2767_v5 = vpop.f32.mrf.mxu1 }
 0xcc4   : > { %v2018_v7 = vadd.f32 %v2017_v4, %v3471_v1 }
 0xcc5   : > { %v2014_v8 = vpop.f32.mrf.mxu1 }
 0xcc6   : > { %v3618_v10 = vadd.f32 %v2546_v6, %v2018_v7 }
 0xcc7   : > { %v2768_v11 = vpop.f32.mrf.mxu1 }
 0xcc8   : > { %2027 = vadd.xlane.f32.xlu0 %v3618_v10 }
 0xd51   : > { %v2028_v15 = vpop.xlane.xlu0 %2027 }
 0xd52   : > { %v2029_v16 = vmul.f32 0.03125, %v2028_v15 }
 0xd54   : > { %v2030_v17 = vsub.f32 %v3618_v10, %v2029_v16 }
 0xd56   : > { %v2031_v1 = vmul.f32 %v3108_v18, %v2030_v17 }
 0xd58   : > { %v2032_v19 = vmul.f32 %v2031_v1, %v2031_v1 }
 0xd5a   : > { %2033 = vadd.xlane.f32.xlu1 %v2032_v19 }
 0xde3   : > { %v2034_v34 = vpop.xlane.xlu1 %2033 }
 0xde4   : > { %v2035_v35 = vmul.f32 0.03125, %v2034_v34 }
 0xde6   : > { %v2036_v36 = vadd.f32 1e-05, %v2035_v35 }
 0xde8   : > { %3106 = vrsqrt.f32 %v2036_v36 }
 0xdf5   : > { %v3107_v37 = vpop.eup %3106 }
 0xdf6   : > { %v2038_v20 = vmul.f32 %v3107_v37, %v2031_v1 }
 0xdf8   : > { %v2043_v40 = vmul.f32 %v2547_v38, %v2038_v20 }
 0xdfa   : > { %v2048_v41 = vadd.f32 %v2548_v39, %v2043_v40 }
 0xdfc   : > { %v2049_v42 = vpack.c.bf16 %v2048_v41, %v2048_v41 }
 0xdfe   : > { %2786 = vmatmul.mubr.bf16.vlgmr.msra.gmra.mxu0 %v2049_v42 }
 0xebe   : > { %v2153_v46 = vpop.f32.mrf.mxu0 }
 0xebf   : > { %v2154_v47 = vadd.f32 %v2549_v45, %v2153_v46 }
 0xec0   : > { %v2787_v32 = vpop.f32.mrf.mxu0 }
 0xec1   : > { %v2159_v48 = vmax.f32 %v2154_v47, 0.0 }
 0xec2   : > { %v2156_v49 = vpop.f32.mrf.mxu0 }
 0xec3   : > { %v2160_v50 = vpack.c.bf16 %v2159_v48, %v2159_v48 }
 0xec4   : > { %v2788_v51 = vpop.f32.mrf.mxu0 }
 0xec5   : > { %2806 = vmatmul.mubr.bf16.vlgmr.msra.gmra.mxu1 %v2160_v50 }
 0xf85   : > { %v2264_v56 = vpop.f32.mrf.mxu1 }
 0xf86   : > { %v2265_v52 = vadd.f32 %v2558_v55, %v2264_v56 }
 0xf87   : > { %v2807_v57 = vpop.f32.mrf.mxu1 }
 0xf88   : > { %v2270_v59 = vadd.f32 %v2265_v52, %v3618_v10 }
 0xf89   : > { %v2267_v12 = vpop.f32.mrf.mxu1 }
 0xf8a   : > { %2271 = vst [vmem:[%s256_s12] sm:$0xff] %v2270_v59 }
 0xf8b   : > { %v2808_v53 = vpop.f32.mrf.mxu1 }
 0xf8c   : > { %3228 = shalt.err (!%p3225_p9)
}
 0xf8d   : > { %s3229_s10 = scalar_lea.hbm %s3642_s30, 128  ;;  %s3233_s25 = scalar_lea.hbm %s3689_s4, 256 }
 0xf8e   : > { %p3230_p13 = scmp.ne.s32.totalorder %s3642_s30, %s3229_s10  ;;  %p3234_p8 = scmp.lt.s32.totalorder %s3642_s30, %s3689_s4 }
 0xf8f   : > { %p3235_p2 = scmp.lt.s32.totalorder %s3233_s25, %s3229_s10 }
 0xf90   : > { %p3231_p7 = pnand %p3230_p13, %p3707_p0 }
 0xf91   : > { %p3236_p11 = por %p3235_p2, %p3234_p8 }
 0xf92   : > { %p3232_p4 = pneg %p3231_p7 }
 0xf94   : > { %p3237_p12 = pnand %p3236_p11, %p3232_p4 }
 0xf96   : > { %3240 = shalt.err (!%p3237_p12)
}
 0xf97   : > { %2823 = dma.vmem_to_hbm [thread:$0]  (%p3707_p0), %s3644_s14, 128, %s3642_s30, %s2273_s19  }
 0xf98 PF: > { %s2298_s21 = sand.u32 1, %s3275_s15   ;;  %p3708_p5 = scmp.ne.s32.totalorder %s3695_s22, 0 }
 0xf99   : > { %p3709_p10 = scmp.ge.s32.totalorder %s3287_s18, 2  ;;  %s2299_s23 = scalar_lea.sflag [#allocation4], %s2298_s21 }
 0xf9b   : > { %p2840_p1 = pnand %p3709_p10, %p3708_p5 }
 0xf9d   : > { %p2841_p3 = pneg %p2840_p1 }
 0xf9f   : > { %3270 = dma.done.wait (%p2841_p3), %s2299_s23, 128  }
 0xfa0   : > { %3272 = vsyncadd (%p2841_p3), %s2299_s23, 4294967168  ;;  %p19_p6 = scmp.ge.s32.totalorder %s3409_s29, 4   ;;  %s3710_s15 = smov %s3279_s16 }
 0xfa1   : > { %s3711_s16 = smov %s3283_s17  ;;  %s3712_s17 = smov %s3419_s6 }
 0xfa2   : > { %s3713_s18 = smov %s3409_s29  ;;  %21 = sbr.rel (!%p19_p6) target bundleno = 7 (0x7), region = 93 }
 0xfa7   :  { %2304 = vsyncpa [#allocation3], 1 }
 0xfa8   :  { %2306 = vsyncpa [#allocation3 + $0x1], 1 }
 0xfa9   :  { %2307 = vsyncpa [#allocation6], 1 }
 0xfaa   :  { %2308 = vsyncpa [#allocation9], 1 }
 0xfab   :  { %2309 = vsyncpa [#allocation4], 1 }
 0xfac   :  { %2311 = vsyncpa [#allocation4 + $0x1], 1 }

</bundles_post_ra>
